<compile_context>
chip_gen: v6e
topology: v6e:2x2x1
jax: 0.10.0
libtpu: 0.0.40
codegen_flags: <defaults>
</compile_context>

<pallas_src>
import math

import jax
import jax.numpy as jnp
import numpy as np
from jax import lax
from jax.experimental import pallas as pl
from jax.experimental.pallas import tpu as pltpu

BN_EPS = 1e-5


def _fold_bn(gamma, beta, mean, var):
    """Eval-mode BN -> per-channel (scale, shift) in f32."""
    scale = (gamma / jnp.sqrt(var + BN_EPS)).astype(jnp.float32)
    shift = (beta - mean * scale).astype(jnp.float32)
    return scale, shift


def _make_bottleneck_kernel(H, W, Cin, P, stride, has_down):
    """Fused Bottleneck kernel for one sample, channels-last (H, W, C)."""
    Cout = 4 * P
    Ho = (H + 2 - 3) // stride + 1
    Wo = (W + 2 - 3) // stride + 1

    def kernel(x_ref, w1_ref, b1_ref, w2_ref, b2_ref, w3_ref, b3_ref, *rest):
        if has_down:
            wd_ref, bd_ref, o_ref = rest
        else:
            (o_ref,) = rest

        x = x_ref[...]                                   # (H, W, Cin) bf16
        xf = x.reshape(H * W, Cin)

        # ---- conv1 (1x1, BN1 scale pre-folded into weights) + shift + ReLU --
        h1 = jnp.dot(xf, w1_ref[...], preferred_element_type=jnp.float32)
        h1 = jnp.maximum(h1 + b1_ref[...], 0.0).astype(jnp.bfloat16)
        h1 = h1.reshape(H, W, P)

        # ---- zero-pad by 1 on each side as a value (no scratch, no zero pass)
        zrow = jnp.zeros((1, W, P), jnp.bfloat16)
        zcol = jnp.zeros((H + 2, 1, P), jnp.bfloat16)
        h1p = jnp.concatenate([zrow, h1, zrow], axis=0)          # (H+2, W,   P)
        h1p = jnp.concatenate([zcol, h1p, zcol], axis=1)         # (H+2, W+2, P)

        # ---- conv2 (3x3, stride, padding=1) as ONE big-K matmul --------------
        if stride == 1:
            taps = [h1p[dy:dy + H, dx:dx + W, :].reshape(H * W, P)
                    for dy in range(3) for dx in range(3)]
        else:  # stride == 2: even/odd splits via free reshapes (no strided ds)
            Hp, Wp = H + 2, W + 2
            rows = h1p.reshape(Hp // 2, 2, Wp, P)
            r_even = rows[:, 0, :, :]                     # rows 0,2,4,...
            r_odd = rows[:, 1, :, :]                      # rows 1,3,5,...
            row_sel = {0: r_even[0:Ho], 1: r_odd[0:Ho], 2: r_even[1:Ho + 1]}

            def col_sel(t, dx):                           # t: (Ho, Wp, P)
                tr = t.reshape(Ho, Wp // 2, 2, P)
                if dx == 0:
                    return tr[:, 0:Wo, 0, :]              # cols 0,2,...
                if dx == 1:
                    return tr[:, 0:Wo, 1, :]              # cols 1,3,...
                return tr[:, 1:Wo + 1, 0, :]              # cols 2,4,...

            taps = [col_sel(row_sel[dy], dx).reshape(Ho * Wo, P)
                    for dy in range(3) for dx in range(3)]

        patches = jnp.concatenate(taps, axis=-1)                 # (Ho*Wo, 9P) bf16
        h2 = jnp.dot(patches, w2_ref[...], preferred_element_type=jnp.float32)
        h2 = jnp.maximum(h2 + b2_ref[...], 0.0).astype(jnp.bfloat16)

        # ---- conv3 (1x1) + BN3 shift -----------------------------------------
        h3 = jnp.dot(h2, w3_ref[...], preferred_element_type=jnp.float32)
        h3 = h3 + b3_ref[...]

        # ---- residual ----------------------------------------------------------
        if has_down:
            if stride == 1:
                xs = xf
            else:
                xr = x.reshape(H // 2, 2, W, Cin)[:, 0, :, :]        # even rows
                xs = xr.reshape(Ho, W // 2, 2, Cin)[:, :, 0, :]      # even cols
                xs = xs.reshape(Ho * Wo, Cin)
            res = jnp.dot(xs, wd_ref[...], preferred_element_type=jnp.float32)
            res = res + bd_ref[...]
        else:
            res = xf.astype(jnp.float32)                 # identity (Cin == 4P)

        out = jnp.maximum(h3 + res, 0.0)
        o_ref[...] = out.reshape(Ho, Wo, Cout).astype(o_ref.dtype)

    return kernel


def bottleneck_pallas(x_nchw, params, *, stride=1):
    """Bottleneck forward.  x_nchw: (N, Cin, H, W).  Returns (N, 4*planes, Ho, Wo) bf16."""
    has_down = 'wd' in params
    N, Cin, H, W = x_nchw.shape
    P = params['w1'].shape[1]
    Cout = 4 * P
    assert stride in (1, 2), "ResNet Bottleneck uses stride 1 or 2"
    Ho = (H + 2 - 3) // stride + 1
    Wo = (W + 2 - 3) // stride + 1
    assert H % 8 == 0 and W % 8 == 0 and Wo % 8 == 0, "layout-friendly spatial dims"
    if not has_down:
        assert stride == 1 and Cin == Cout, "identity shortcut needs matching shapes"

    # TODO(synk): keep the surrounding network NHWC end-to-end; these transposes are
    #             extra HBM passes kept only to match the PyTorch NCHW interface.
    x_nhwc = jnp.transpose(x_nchw, (0, 2, 3, 1)).astype(jnp.bfloat16)

    # Fold BN scale into the bf16 weights (one-time transform); keep only the shift.
    s1, b1 = _fold_bn(*params['bn1'])
    s2, b2 = _fold_bn(*params['bn2'])
    s3, b3 = _fold_bn(*params['bn3'])
    w1e = (params['w1'].astype(jnp.float32) * s1[None, :]).astype(jnp.bfloat16)
    w2e = (params['w2'].astype(jnp.float32) * s2[None, None, :]
           ).reshape(9 * P, P).astype(jnp.bfloat16)
    w3e = (params['w3'].astype(jnp.float32) * s3[None, :]).astype(jnp.bfloat16)
    b1 = b1.reshape(1, P)
    b2 = b2.reshape(1, P)
    b3 = b3.reshape(1, Cout)

    inputs = [x_nhwc, w1e, b1, w2e, b2, w3e, b3]
    in_specs = [
        pl.BlockSpec((None, H, W, Cin), lambda n: (n, 0, 0, 0)),
        pl.BlockSpec((Cin, P), lambda n: (0, 0)),
        pl.BlockSpec((1, P), lambda n: (0, 0)),
        pl.BlockSpec((9 * P, P), lambda n: (0, 0)),
        pl.BlockSpec((1, P), lambda n: (0, 0)),
        pl.BlockSpec((P, Cout), lambda n: (0, 0)),
        pl.BlockSpec((1, Cout), lambda n: (0, 0)),
    ]
    if has_down:
        sd, bd = _fold_bn(*params['bnd'])
        wde = (params['wd'].astype(jnp.float32) * sd[None, :]).astype(jnp.bfloat16)
        inputs += [wde, bd.reshape(1, Cout)]
        in_specs += [
            pl.BlockSpec((Cin, Cout), lambda n: (0, 0)),
            pl.BlockSpec((1, Cout), lambda n: (0, 0)),
        ]

    kernel = _make_bottleneck_kernel(H, W, Cin, P, stride, has_down)

    out = pl.pallas_call(
        kernel,
        out_shape=jax.ShapeDtypeStruct((N, Ho, Wo, Cout), jnp.bfloat16),
        grid=(N,),
        in_specs=in_specs,
        out_specs=pl.BlockSpec((None, Ho, Wo, Cout), lambda n: (n, 0, 0, 0)),
        compiler_params=pltpu.CompilerParams(
            dimension_semantics=("parallel",),          # samples shard across cores
            vmem_limit_bytes=32 * 1024 * 1024),          # > v5e 16MiB default, < v7x 64MiB
    )(*inputs)

    return jnp.transpose(out, (0, 3, 1, 2))              # back to NCHW


# ---------------------------------------------------------------------------
# Pure-JAX (XLA, f32) reference for a numerical sanity check.
# ---------------------------------------------------------------------------
def bottleneck_reference(x_nchw, params, *, stride=1):
    has_down = 'wd' in params
    P = params['w1'].shape[1]
    x = jnp.transpose(x_nchw, (0, 2, 3, 1)).astype(jnp.float32)   # NHWC

    def bn(h, bn_params):
        g, b, m, v = bn_params
        scale = g / jnp.sqrt(v + BN_EPS)
        return h * scale + (b - m * scale)

    h = jnp.einsum('nhwc,cd->nhwd', x, params['w1'].astype(jnp.float32))
    h = jnp.maximum(bn(h, params['bn1']), 0.0)

    w2 = params['w2'].astype(jnp.float32).reshape(3, 3, P, P)     # HWIO
    h = lax.conv_general_dilated(
        h, w2, window_strides=(stride, stride), padding=((1, 1), (1, 1)),
        dimension_numbers=('NHWC', 'HWIO', 'NHWC'))
    h = jnp.maximum(bn(h, params['bn2']), 0.0)

    h = jnp.einsum('nhwc,cd->nhwd', h, params['w3'].astype(jnp.float32))
    h = bn(h, params['bn3'])

    if has_down:
        xs = x[:, ::stride, ::stride, :]
        res = bn(jnp.einsum('nhwc,cd->nhwd', xs, params['wd'].astype(jnp.float32)),
                 params['bnd'])
    else:
        res = x
    out = jnp.maximum(h + res, 0.0)
    return jnp.transpose(out, (0, 3, 1, 2))


# ---------------------------------------------------------------------------
# Deterministic parameter init (shapes mirror the PyTorch module; weights bf16).
# ---------------------------------------------------------------------------
def init_params(key, inplanes, planes, has_down):
    Cout = 4 * planes
    ks = jax.random.split(key, 8)

    def conv_w(k, cin, cout, taps=1):
        std = math.sqrt(2.0 / (max(taps, 1) * cout))
        shape = (taps, cin, cout) if taps > 1 else (cin, cout)
        return (jax.random.normal(k, shape, jnp.float32) * std).astype(jnp.bfloat16)

    def bn_p(k, c):
        k1, k2, k3, k4 = jax.random.split(k, 4)
        gamma = 1.0 + 0.1 * jax.random.normal(k1, (c,), jnp.float32)
        beta = 0.1 * jax.random.normal(k2, (c,), jnp.float32)
        mean = 0.1 * jax.random.normal(k3, (c,), jnp.float32)
        var = jnp.abs(jax.random.normal(k4, (c,), jnp.float32)) + 0.5
        return (gamma, beta, mean, var)

    params = {
        'w1': conv_w(ks[0], inplanes, planes),
        'bn1': bn_p(ks[1], planes),
        'w2': conv_w(ks[2], planes, planes, taps=9),
        'bn2': bn_p(ks[3], planes),
        'w3': conv_w(ks[4], planes, Cout),
        'bn3': bn_p(ks[5], Cout),
    }
    if has_down:
        params['wd'] = conv_w(ks[6], inplanes, Cout)
        params['bnd'] = bn_p(ks[7], Cout)
    return params


if __name__ == "__main__":
    key = jax.random.PRNGKey(0)
    N, H, W = 2, 16, 16
    # NOTE: production ResNet stages have >=128 channels (lane-dense); these small
    # channel counts are only a smoke test.
    configs = [
        # identity shortcut (downsample=None): inplanes == planes*4, stride=1
        dict(inplanes=64, planes=16, stride=1, has_down=False),
        # projection shortcut: stride=2 with 1x1-conv + BN downsample
        dict(inplanes=32, planes=16, stride=2, has_down=True),
    ]
    for cfg in configs:
        key, kx, kp = jax.random.split(key, 3)
        x = jax.random.normal(kx, (N, cfg['inplanes'], H, W), jnp.float32)
        params = init_params(kp, cfg['inplanes'], cfg['planes'], cfg['has_down'])

        out = jax.block_until_ready(
            bottleneck_pallas(x, params, stride=cfg['stride']))
        ref = jax.block_until_ready(
            bottleneck_reference(x, params, stride=cfg['stride']))

        out_f32 = np.asarray(out.astype(jnp.float32))
        ref_f32 = np.asarray(ref)
        # bf16 activations + folded-scale bf16 weights vs f32 reference -> relaxed tol.
        if not np.allclose(out_f32, ref_f32, rtol=5e-2, atol=2e-1):
            err = float(np.max(np.abs(out_f32 - ref_f32)))
            raise AssertionError(f"Bottleneck mismatch (config {cfg}): max abs err {err}")

    print("KERNEL_OK")
</pallas_src>

<mosaic_0001>
module attributes {stable_mosaic.version = 11 : i64} {
  func.func @kernel(%arg0: i32, %arg1: memref<1x16x16x64xbf16, #tpu.memory_space<vmem>>, %arg2: memref<64x16xbf16, #tpu.memory_space<vmem>>, %arg3: memref<1x16xf32, #tpu.memory_space<vmem>>, %arg4: memref<144x16xbf16, #tpu.memory_space<vmem>>, %arg5: memref<1x16xf32, #tpu.memory_space<vmem>>, %arg6: memref<16x64xbf16, #tpu.memory_space<vmem>>, %arg7: memref<1x64xf32, #tpu.memory_space<vmem>>, %arg8: memref<1x16x16x64xbf16, #tpu.memory_space<vmem>>) attributes {dimension_semantics = [#tpu.dimension_semantics<parallel>], iteration_bounds = array<i64: 2>, scalar_prefetch = 0 : i64, scratch_operands = 0 : i64, tpu.core_type = #tpu.core_type<tc>, window_params = [{transform_indices = @transform_0, window_bounds = array<i64: 1, 16, 16, 64>}, {pipeline_mode = #tpu.pipeline_mode<synchronous>, transform_indices = @transform_1, window_bounds = array<i64: 64, 16>}, {pipeline_mode = #tpu.pipeline_mode<synchronous>, transform_indices = @transform_2, window_bounds = array<i64: 1, 16>}, {pipeline_mode = #tpu.pipeline_mode<synchronous>, transform_indices = @transform_3, window_bounds = array<i64: 144, 16>}, {pipeline_mode = #tpu.pipeline_mode<synchronous>, transform_indices = @transform_4, window_bounds = array<i64: 1, 16>}, {pipeline_mode = #tpu.pipeline_mode<synchronous>, transform_indices = @transform_5, window_bounds = array<i64: 16, 64>}, {pipeline_mode = #tpu.pipeline_mode<synchronous>, transform_indices = @transform_6, window_bounds = array<i64: 1, 64>}, {transform_indices = @transform_7, window_bounds = array<i64: 1, 16, 16, 64>}]} {
    %c0 = arith.constant 0 : index
    %c0_0 = arith.constant 0 : index
    %c0_1 = arith.constant 0 : index
    %c0_2 = arith.constant 0 : index
    %0 = vector.load %arg1[%c0, %c0_0, %c0_1, %c0_2] : memref<1x16x16x64xbf16, #tpu.memory_space<vmem>>, vector<1x16x16x64xbf16>
    %1 = vector.shape_cast %0 : vector<1x16x16x64xbf16> to vector<16x16x64xbf16>
    %2 = vector.shape_cast %1 : vector<16x16x64xbf16> to vector<256x64xbf16>
    %c0_3 = arith.constant 0 : index
    %c0_4 = arith.constant 0 : index
    %3 = vector.load %arg2[%c0_3, %c0_4] : memref<64x16xbf16, #tpu.memory_space<vmem>>, vector<64x16xbf16>
    %cst = arith.constant dense<0.000000e+00> : vector<256x16xf32>
    %4 = tpu.matmul %2, %3, %cst {dimension_numbers = #tpu.dot_dimension_numbers<[1], [0], [0], [1], [0, 0, 1, 1], [], []>} : vector<256x64xbf16>, vector<64x16xbf16>, vector<256x16xf32> -> vector<256x16xf32>
    %c0_5 = arith.constant 0 : index
    %c0_6 = arith.constant 0 : index
    %5 = vector.load %arg3[%c0_5, %c0_6] : memref<1x16xf32, #tpu.memory_space<vmem>>, vector<1x16xf32>
    %6 = vector.broadcast %5 : vector<1x16xf32> to vector<256x16xf32>
    %7 = arith.addf %4, %6 : vector<256x16xf32>
    %cst_7 = arith.constant 0.000000e+00 : f32
    %8 = vector.broadcast %cst_7 : f32 to vector<256x16xf32>
    %9 = arith.maximumf %7, %8 : vector<256x16xf32>
    %10 = arith.truncf %9 : vector<256x16xf32> to vector<256x16xbf16>
    %11 = vector.shape_cast %10 : vector<256x16xbf16> to vector<16x16x16xbf16>
    %cst_8 = arith.constant 0.000000e+00 : bf16
    %12 = vector.broadcast %cst_8 : bf16 to vector<1x16x16xbf16>
    %cst_9 = arith.constant 0.000000e+00 : bf16
    %13 = vector.broadcast %cst_9 : bf16 to vector<18x1x16xbf16>
    %14 = tpu.concatenate %12, %11, %12 in 0 : vector<1x16x16xbf16>, vector<16x16x16xbf16>, vector<1x16x16xbf16> -> vector<18x16x16xbf16>
    %15 = tpu.concatenate %13, %14, %13 in 1 : vector<18x1x16xbf16>, vector<18x16x16xbf16>, vector<18x1x16xbf16> -> vector<18x18x16xbf16>
    %16 = vector.extract_strided_slice %15 {offsets = [0, 0, 0], sizes = [16, 16, 16], strides = [1, 1, 1]} : vector<18x18x16xbf16> to vector<16x16x16xbf16>
    %17 = vector.shape_cast %16 : vector<16x16x16xbf16> to vector<256x16xbf16>
    %18 = vector.extract_strided_slice %15 {offsets = [0, 1, 0], sizes = [16, 16, 16], strides = [1, 1, 1]} : vector<18x18x16xbf16> to vector<16x16x16xbf16>
    %19 = vector.shape_cast %18 : vector<16x16x16xbf16> to vector<256x16xbf16>
    %20 = vector.extract_strided_slice %15 {offsets = [0, 2, 0], sizes = [16, 16, 16], strides = [1, 1, 1]} : vector<18x18x16xbf16> to vector<16x16x16xbf16>
    %21 = vector.shape_cast %20 : vector<16x16x16xbf16> to vector<256x16xbf16>
    %22 = vector.extract_strided_slice %15 {offsets = [1, 0, 0], sizes = [16, 16, 16], strides = [1, 1, 1]} : vector<18x18x16xbf16> to vector<16x16x16xbf16>
    %23 = vector.shape_cast %22 : vector<16x16x16xbf16> to vector<256x16xbf16>
    %24 = vector.extract_strided_slice %15 {offsets = [1, 1, 0], sizes = [16, 16, 16], strides = [1, 1, 1]} : vector<18x18x16xbf16> to vector<16x16x16xbf16>
    %25 = vector.shape_cast %24 : vector<16x16x16xbf16> to vector<256x16xbf16>
    %26 = vector.extract_strided_slice %15 {offsets = [1, 2, 0], sizes = [16, 16, 16], strides = [1, 1, 1]} : vector<18x18x16xbf16> to vector<16x16x16xbf16>
    %27 = vector.shape_cast %26 : vector<16x16x16xbf16> to vector<256x16xbf16>
    %28 = vector.extract_strided_slice %15 {offsets = [2, 0, 0], sizes = [16, 16, 16], strides = [1, 1, 1]} : vector<18x18x16xbf16> to vector<16x16x16xbf16>
    %29 = vector.shape_cast %28 : vector<16x16x16xbf16> to vector<256x16xbf16>
    %30 = vector.extract_strided_slice %15 {offsets = [2, 1, 0], sizes = [16, 16, 16], strides = [1, 1, 1]} : vector<18x18x16xbf16> to vector<16x16x16xbf16>
    %31 = vector.shape_cast %30 : vector<16x16x16xbf16> to vector<256x16xbf16>
    %32 = vector.extract_strided_slice %15 {offsets = [2, 2, 0], sizes = [16, 16, 16], strides = [1, 1, 1]} : vector<18x18x16xbf16> to vector<16x16x16xbf16>
    %33 = vector.shape_cast %32 : vector<16x16x16xbf16> to vector<256x16xbf16>
    %34 = tpu.concatenate %17, %19, %21, %23, %25, %27, %29, %31, %33 in 1 : vector<256x16xbf16>, vector<256x16xbf16>, vector<256x16xbf16>, vector<256x16xbf16>, vector<256x16xbf16>, vector<256x16xbf16>, vector<256x16xbf16>, vector<256x16xbf16>, vector<256x16xbf16> -> vector<256x144xbf16>
    %c0_10 = arith.constant 0 : index
    %c0_11 = arith.constant 0 : index
    %35 = vector.load %arg4[%c0_10, %c0_11] : memref<144x16xbf16, #tpu.memory_space<vmem>>, vector<144x16xbf16>
    %cst_12 = arith.constant dense<0.000000e+00> : vector<256x16xf32>
    %36 = tpu.matmul %34, %35, %cst_12 {dimension_numbers = #tpu.dot_dimension_numbers<[1], [0], [0], [1], [0, 0, 1, 1], [], []>} : vector<256x144xbf16>, vector<144x16xbf16>, vector<256x16xf32> -> vector<256x16xf32>
    %c0_13 = arith.constant 0 : index
    %c0_14 = arith.constant 0 : index
    %37 = vector.load %arg5[%c0_13, %c0_14] : memref<1x16xf32, #tpu.memory_space<vmem>>, vector<1x16xf32>
    %38 = vector.broadcast %37 : vector<1x16xf32> to vector<256x16xf32>
    %39 = arith.addf %36, %38 : vector<256x16xf32>
    %cst_15 = arith.constant 0.000000e+00 : f32
    %40 = vector.broadcast %cst_15 : f32 to vector<256x16xf32>
    %41 = arith.maximumf %39, %40 : vector<256x16xf32>
    %42 = arith.truncf %41 : vector<256x16xf32> to vector<256x16xbf16>
    %c0_16 = arith.constant 0 : index
    %c0_17 = arith.constant 0 : index
    %43 = vector.load %arg6[%c0_16, %c0_17] : memref<16x64xbf16, #tpu.memory_space<vmem>>, vector<16x64xbf16>
    %cst_18 = arith.constant dense<0.000000e+00> : vector<256x64xf32>
    %44 = tpu.matmul %42, %43, %cst_18 {dimension_numbers = #tpu.dot_dimension_numbers<[1], [0], [0], [1], [0, 0, 1, 1], [], []>} : vector<256x16xbf16>, vector<16x64xbf16>, vector<256x64xf32> -> vector<256x64xf32>
    %c0_19 = arith.constant 0 : index
    %c0_20 = arith.constant 0 : index
    %45 = vector.load %arg7[%c0_19, %c0_20] : memref<1x64xf32, #tpu.memory_space<vmem>>, vector<1x64xf32>
    %46 = vector.broadcast %45 : vector<1x64xf32> to vector<256x64xf32>
    %47 = arith.addf %44, %46 : vector<256x64xf32>
    %48 = arith.extf %2 : vector<256x64xbf16> to vector<256x64xf32>
    %49 = arith.addf %47, %48 : vector<256x64xf32>
    %cst_21 = arith.constant 0.000000e+00 : f32
    %50 = vector.broadcast %cst_21 : f32 to vector<256x64xf32>
    %51 = arith.maximumf %49, %50 : vector<256x64xf32>
    %52 = vector.shape_cast %51 : vector<256x64xf32> to vector<16x16x64xf32>
    %53 = arith.truncf %52 : vector<16x16x64xf32> to vector<16x16x64xbf16>
    %c0_22 = arith.constant 0 : index
    %c0_23 = arith.constant 0 : index
    %c0_24 = arith.constant 0 : index
    %c0_25 = arith.constant 0 : index
    %54 = vector.load %arg8[%c0_22, %c0_23, %c0_24, %c0_25] : memref<1x16x16x64xbf16, #tpu.memory_space<vmem>>, vector<1x16x16x64xbf16>
    %55 = vector.shape_cast %54 : vector<1x16x16x64xbf16> to vector<16x16x64xbf16>
    %56 = vector.shape_cast %53 : vector<16x16x64xbf16> to vector<1x16x16x64xbf16>
    tpu.vector_store %arg8[%c0_22, %c0_23, %c0_24, %c0_25], %56 {strides = array<i32>} : memref<1x16x16x64xbf16, #tpu.memory_space<vmem>>, vector<1x16x16x64xbf16>,
    return
  }
  func.func @transform_0(%arg0: i32) -> (i32, i32, i32, i32) {
    %c0_i32 = arith.constant 0 : i32
    %c0_i32_0 = arith.constant 0 : i32
    %c0_i32_1 = arith.constant 0 : i32
    %c0_i32_2 = arith.constant 0 : i32
    return %arg0, %c0_i32, %c0_i32_0, %c0_i32_1 : i32, i32, i32, i32
  }
  func.func @transform_1(%arg0: i32) -> (i32, i32) {
    %c0_i32 = arith.constant 0 : i32
    %c0_i32_0 = arith.constant 0 : i32
    %c0_i32_1 = arith.constant 0 : i32
    return %c0_i32, %c0_i32_0 : i32, i32
  }
  func.func @transform_2(%arg0: i32) -> (i32, i32) {
    %c0_i32 = arith.constant 0 : i32
    %c0_i32_0 = arith.constant 0 : i32
    %c0_i32_1 = arith.constant 0 : i32
    return %c0_i32, %c0_i32_0 : i32, i32
  }
  func.func @transform_3(%arg0: i32) -> (i32, i32) {
    %c0_i32 = arith.constant 0 : i32
    %c0_i32_0 = arith.constant 0 : i32
    %c0_i32_1 = arith.constant 0 : i32
    return %c0_i32, %c0_i32_0 : i32, i32
  }
  func.func @transform_4(%arg0: i32) -> (i32, i32) {
    %c0_i32 = arith.constant 0 : i32
    %c0_i32_0 = arith.constant 0 : i32
    %c0_i32_1 = arith.constant 0 : i32
    return %c0_i32, %c0_i32_0 : i32, i32
  }
  func.func @transform_5(%arg0: i32) -> (i32, i32) {
    %c0_i32 = arith.constant 0 : i32
    %c0_i32_0 = arith.constant 0 : i32
    %c0_i32_1 = arith.constant 0 : i32
    return %c0_i32, %c0_i32_0 : i32, i32
  }
  func.func @transform_6(%arg0: i32) -> (i32, i32) {
    %c0_i32 = arith.constant 0 : i32
    %c0_i32_0 = arith.constant 0 : i32
    %c0_i32_1 = arith.constant 0 : i32
    return %c0_i32, %c0_i32_0 : i32, i32
  }
  func.func @transform_7(%arg0: i32) -> (i32, i32, i32, i32) {
    %c0_i32 = arith.constant 0 : i32
    %c0_i32_0 = arith.constant 0 : i32
    %c0_i32_1 = arith.constant 0 : i32
    %c0_i32_2 = arith.constant 0 : i32
    return %arg0, %c0_i32, %c0_i32_0, %c0_i32_1 : i32, i32, i32, i32
  }
}

</mosaic_0001>

<bundles_post_ra>
// kernel: tpu_custom_call.1
= control target key start
LH: loop header
LB: loop body
LE: loop exit
PB: predicated region body
PF: predicated region fallthrough
CT: control target
= control target key end

     0   :  { %12 = vsyncpa [#allocation3], 0  ;;  %s4236_s0 = inlined_call_operand.hbm [shape: bf16[2,16,16,64], index: 0, kind: input, shape index: {}]   ;;  %s4237_s1 = inlined_call_operand.vmem [shape: bf16[64,16], index: 1, kind: input, shape index: {}]   ;;  %s4238_s2 = inlined_call_operand.vmem [shape: f32[1,16], index: 2, kind: input, shape index: {}]   ;;  %s4239_s3 = inlined_call_operand.vmem [shape: bf16[144,16], index: 3, kind: input, shape index: {}]   ;;  %s4240_s4 = inlined_call_operand.vmem [shape: f32[1,16], index: 4, kind: input, shape index: {}]   ;;  %s4241_s5 = inlined_call_operand.vmem [shape: bf16[16,64], index: 5, kind: input, shape index: {}]   ;;  %s4242_s6 = inlined_call_operand.vmem [shape: f32[1,64], index: 6, kind: input, shape index: {}]   ;;  %s4243_s7 = inlined_call_operand.hbm [shape: bf16[2,16,16,64], index: 7, kind: output, shape index: {}]  }
   0x1   :  { %14 = vsyncpa [#allocation3 + $0x1], 0 }
   0x2   :  { %15 = vsyncpa [#allocation4], 0 }
   0x3   :  { %17 = vsyncpa [#allocation4 + $0x1], 0  ;;  %s3118_s24 = smov 0   ;;  %s3120_s25 = smov 0  }
   0x4   :  { %s3122_s26 = smov 0   ;;  %s3124_s27 = smov 0  }
   0x5 LB: > { %s3139_s28 = sadd.s32 4294967295, %s3063_s27   ;;  %s2562_s29 = sadd.s32 4294967294, %s3063_s27   ;;  %s3063_s27 = sphi %s3124_s27, %s4260_s27   ;;  %s3059_s26 = sphi %s3122_s26, %s4259_s26   ;;  %s3055_s25 = sphi %s3120_s25, %s4258_s25   ;;  %s3051_s24 = sphi %s3118_s24, %s4257_s24  }
   0x6   : > { %s3143_s30 = sadd.s32 1, %s3063_s27   ;;  %s30_s8 = sadd.s32 1, %s3059_s26 }
   0x7   : > { %s27_s9 = ssub.s32 %s3063_s27, %s3143_s30  ;;  %p37_p0 = scmp.ne.s32.totalorder %s3059_s26, %s3055_s25 }
   0x8   : > { %p28_p1 = scmp.eq.s32.totalorder %s27_s9, 0  ;;  %p38_p2 = scmp.eq.s32.totalorder %s3063_s27, 0 }
   0x9   : > { %p43_p3 = scmp.ne.s32.totalorder %s3055_s25, %s3051_s24  ;;  %p44_p4 = scmp.eq.s32.totalorder %s3139_s28, 0 }
   0xa   : > { %s3155_s10 = scalar_select %p28_p1, %s3059_s26, %s30_s8  }
   0xb   : > { %p3157_p5 = por %p38_p2, %p37_p0  ;;  %p3161_p6 = por %p44_p4, %p43_p3 }
   0xc   : > { %p193_p7 = scmp.eq.s32.totalorder %s3139_s28, 1  ;;  %p199_p8 = scmp.eq.s32.totalorder %s2562_s29, 1 }
   0xd   : > { %s4247_s12 = scalar_select %p3161_p6, 1, 0 }
   0xe   : > { %p2864_p10 = scmp.lt.s32.totalorder %s3063_s27, 2  ;;  %p3168_p11 = por %p193_p7, %p37_p0 }
   0xf   : > { %p3172_p12 = por %p199_p8, %p43_p3  ;;  %s237_s15 = sand.u32 1, %s3059_s26  }
  0x10   : > { %s4248_s13 = scalar_select %p3168_p11, 1, 0 }
  0x11   : > { %s4249_s14 = scalar_select %p3172_p12, 1, 0 }
  0x12   : > { %s2689_s16 = sshll.u32 %s3063_s27, 11  ;;  %s2565_s17 = sshll.u32 %s237_s15, 7 }
  0x13   : > { %s3181_s20 = scalar_lea.hbm %s4236_s0, %s2689_s16  ;;  %s241_s21 = scalar_lea.vmem [#allocation2], %s2565_s17 }
  0x14   : > { %s248_s22 = sshll.u32 %s241_s21, 4  ;;  %p3185_p13 = pnand %p2864_p10, %p3157_p5  ;;  %s3189_s22 = int_to_ptr.vmem [resolvable:$true] %s248_s22 }
  0x15   : > { %s3191_s29 = scalar_lea.sflag [#allocation3], %s237_s15  ;;  %s2971_s8 = scalar_lea.hbm %s3181_s20, 2048 }
  0x16   : > { %p2972_p0 = scmp.ne.s32.totalorder %s3181_s20, %s2971_s8  ;;  %p2973_p1 = pneg %p3185_p13 }
  0x17   : > { %s2976_s17 = scalar_lea.hbm %s4236_s0, 4096  ;;  %p2977_p4 = scmp.lt.s32.totalorder %s3181_s20, %s4236_s0 }
  0x18   : > { %p2974_p2 = pnand %p2973_p1, %p2972_p0  ;;  %p2978_p5 = scmp.lt.s32.totalorder %s2976_s17, %s2971_s8 }
  0x1a   : > { %p2975_p3 = pneg %p2974_p2  ;;  %p2979_p7 = por %p2978_p5, %p2977_p4 }
  0x1c   : > { %p2980_p8 = pnand %p2979_p7, %p2975_p3 }
  0x1e   : > { %2983 = shalt.err (!%p2980_p8)
}
  0x1f   : > { %s2984_s15 = scalar_lea.vmem %s3189_s22, 2048  ;;  %s3065_s19 = smov [#allocation2]  }
  0x20   : > { %p2985_p10 = scmp.ne.s32.totalorder %s3189_s22, %s2984_s15  ;;  %s2989_s21 = sshll.u32 %s3065_s19, 4  ;;  %s2990_s21 = int_to_ptr.vmem [resolvable:$false] %s2989_s21 }
  0x21   : > { %s2991_s9 = scalar_lea.vmem %s2990_s21, 4096  ;;  %p2992_p2 = scmp.lt.s32.totalorder %s3189_s22, %s2990_s21 }
  0x22   : > { %p2987_p9 = pnand %p2985_p10, %p2973_p1  ;;  %p2993_p12 = scmp.lt.s32.totalorder %s2991_s9, %s2984_s15 }
  0x24   : > { %p2988_p0 = pneg %p2987_p9  ;;  %p2994_p11 = por %p2993_p12, %p2992_p2 }
  0x26   : > { %p2995_p6 = pnand %p2994_p11, %p2988_p0 }
  0x28   : > { %2998 = shalt.err (!%p2995_p6)
}
  0x29   : > { %s3066_s8 = smov 64   ;;  %s3067_s16 = smov 4  }
  0x2a   : > { %2859 = dma.hbm_to_vmem [thread:$0]  (!%p3185_p13), %s3181_s20, 2048, %s3189_s22, %s3191_s29, %s3066_s8, %s3066_s8, %s3067_s16  }
  0x2b   : > { %p2568_p9 = scmp.ge.s32.totalorder %s3063_s27, 1  ;;  %p256_p1 = scmp.lt.s32.totalorder %s3063_s27, 3 }
  0x2d   : > { %p257_p3 = pnand %p2568_p9, %p256_p1 }
  0x2e   : > { %s3215_s17 = sand.u32 (!%p257_p3), 1, %s3055_s25   ;;  %p4251_p6 = scmp.ne.s32.totalorder (!%p257_p3), %s4247_s12, 0 }
  0x2f   : > { %260 = sbr.rel (%p257_p3) target bundleno = 1044 (0x414), region = 48  ;;  %s2569_s11 = sshll.u32 (!%p257_p3), %s3215_s17, 7 }
  0x30   : > { %s263_s18 = scalar_lea.sflag (!%p257_p3), [#allocation3], %s3215_s17  ;;  %s3221_s15 = scalar_lea.vmem (!%p257_p3), [#allocation2], %s2569_s11 }
  0x34   : > { %3042 = dma.done.wait (%p4251_p6), %s263_s18, 2048  }
  0x35   : > { %3044 = vsyncadd (%p4251_p6), %s263_s18, 4294965248  ;;  %v2909_v0 = vld [vmem:[%s4237_s1 + $0x18] sm:$0xff]   ;;  %v2910_v1 = vld [vmem:[%s4237_s1 + $0x10] sm:$0xff]   ;;  %vm449_vm0 = vcmask 523264   ;;  %v3068_v20 = vmov 0   ;;  %vm860_vm1 = vcmask 1040384  }
  0x36   : > { %2760 = vmatprep.subr.bf16.mxu0 %v2909_v0  ;;  %v2911_v2 = vld [vmem:[%s4237_s1 + $0x8] sm:$0xff]   ;;  %v298_v3 = vld [vmem:[%s3221_s15] sm:$0xff]   ;;  %v302_v6 = vld [vmem:[%s3221_s15 + $0x10] sm:$0xff]   ;;  %v710_v21 = vrot.slane %v3068_v20, 7  ;;  %vm861_vm2 = vsmask.f32 256  ;;  %2834 = vmatprep.subr.bf16.mxu1 %v3068_v20 }
  0x37   : > { %2761 = vmatpush3.bf16.msra.mxu0 %v2909_v0  ;;  %2768 = vmatprep.mubr.msk.bf16.mxu0 %vm449_vm0, %v298_v3  ;;  %v2912_v4 = vld [vmem:[%s4237_s1] sm:$0xff]   ;;  %v300_v5 = vld [vmem:[%s3221_s15 + $0x8] sm:$0xff]   ;;  %v304_v7 = vld [vmem:[%s3221_s15 + $0x18] sm:$0xff]   ;;  %vm1122_vm4 = vcmask 1046528   ;;  %s3069_s8 = smov 32   ;;  %s3070_s16 = smov 16  }
  0x38   : > { %2762 = vmatprep.subr.bf16.mxu0 %v2910_v1  ;;  %v306_v8 = vld [vmem:[%s3221_s15 + $0x20] sm:$0xff]   ;;  %v308_v9 = vld [vmem:[%s3221_s15 + $0x28] sm:$0xff]   ;;  %v310_v10 = vld [vmem:[%s3221_s15 + $0x30] sm:$0xff]   ;;  %vm897_vm5 = vsmask.f32 7424  ;;  %s3071_s23 = smov 48  }
  0x39   : > { %v312_v11 = vld [vmem:[%s3221_s15 + $0x38] sm:$0xff]   ;;  %v314_v12 = vld [vmem:[%s3221_s15 + $0x40] sm:$0xff]   ;;  %v316_v13 = vld [vmem:[%s3221_s15 + $0x48] sm:$0xff]   ;;  %vm1412_vm6 = vcmask 130048   ;;  %s3072_s29 = smov 80   ;;  %s3073_s12 = smov 96  }
  0x3a   : > { %v318_v14 = vld [vmem:[%s3221_s15 + $0x50] sm:$0xff]   ;;  %v320_v15 = vld [vmem:[%s3221_s15 + $0x58] sm:$0xff]   ;;  %v322_v16 = vld [vmem:[%s3221_s15 + $0x60] sm:$0xff]   ;;  %s3074_s19 = smov 64   ;;  %s3075_s18 = smov 112   ;;  %vm1445_vm7 = vcmask 261120  }
  0x3b   : > { %2763 = vmatpush3.bf16.msra.mxu0 %v2910_v1  ;;  %v324_v17 = vld [vmem:[%s3221_s15 + $0x68] sm:$0xff]   ;;  %v326_v18 = vld [vmem:[%s3221_s15 + $0x70] sm:$0xff]   ;;  %v328_v19 = vld [vmem:[%s3221_s15 + $0x78] sm:$0xff]   ;;  %vm1478_vm8 = vcmask 392192   ;;  %vm1576_vm9 = vcmask 785408   ;;  %vm1543_vm10 = vcmask 654336  }
  0x3c   : > { %2764 = vmatprep.subr.bf16.mxu0 %v2911_v2  ;;  %vm3274_vm3 = vmand %vm860_vm1, %vm861_vm2  ;;  %v3300_v36 = vld [vmem:[%s4238_s2] ss:$0 sm:$0xff]  ;;  %v2929_v37 = vld [vmem:[%s4239_s3 + $0x38] sm:$0xff]   ;;  %vm1609_vm11 = vcmask 916480   ;;  %vm2442_vm12 = vcmask 519168   ;;  %s4076_s22 = scalar_lea.vmem [#allocation5], %s2569_s11 }
  0x3d   : > { %v3280_v23 = vsel %vm3274_vm3, 0, %v710_v21  ;;  %v880_v24 = vsel %vm3274_vm3, %v710_v21, 0  ;;  %2843 = vmatpush1.bf16.msra.mxu1 %v2929_v37  ;;  %v2930_v43 = vld [vmem:[%s4239_s3 + $0x30] sm:$0xff]   ;;  %v2931_v53 = vld [vmem:[%s4239_s3 + $0x28] sm:$0xff]   ;;  %v2932_v0 = vld [vmem:[%s4239_s3 + $0x20] sm:$0xff]   ;;  %s2722_s11 = sshll.u32 %s3139_s28, 11 }
  0x3e   : > { %v1123_v25 = vrot.slane %v3280_v23, 1  ;;  %v1124_v26 = vrot.slane %v880_v24, 1  ;;  %v901_v27 = vshll.u32 %v3280_v23, 16  ;;  %v899_v29 = vshrl.u32 %v3280_v23, 16  ;;  %2835 = vmatprep.subr.bf16.mxu1 %v3068_v20  ;;  %s2476_s28 = scalar_lea.sflag [#allocation4], %s3215_s17  ;;  %p4254_p12 = scmp.ne.s32.totalorder %s4248_s13, 0 }
  0x3f   : > { %2765 = vmatpush3.bf16.msra.mxu0 %v2911_v2  ;;  %v906_v31 = vshll.u32 %v880_v24, 16 }
  0x40   : > { %2766 = vmatprep.subr.bf16.mxu0 %v2912_v4  ;;  %v3287_v28 = vsel %vm1122_vm4, %v1123_v25, %v1124_v26  ;;  %v903_v30 = vrot.slane %v901_v27, 1  ;;  %v2934_v26 = vld [vmem:[%s4239_s3 + $0x10] sm:$0xff]  }
  0x41   : > { %1220 = vrot.lane.b32.xlu1 %v3287_v28, %s3069_s8  ;;  %v908_v33 = vrot.slane %v906_v31, 1  ;;  %2844 = vmatpush1.bf16.msra.mxu1 %v2930_v43 }
  0x42   : > { %v904_v32 = vor.u32 %v903_v30, %v899_v29  ;;  %2836 = vmatprep.subr.bf16.mxu1 %v3068_v20 }
  0x43   : > { %2767 = vmatpush3.bf16.msra.mxu0 %v2912_v4 }
  0x44   : > { %1785 = vmatprep.subr.bf16.mxu0 %v3068_v20  ;;  %v3293_v34 = vsel %vm897_vm5, %v904_v32, %v908_v33 }
  0x45   : > { %1188 = vrot.lane.b32.xlu1 %v3293_v34, %s3070_s16  ;;  %2845 = vmatpush1.bf16.msra.mxu1 %v2931_v53 }
  0x46   : > { %2769 = vmatmul.mubr.msk.bf16.vlgmr.msra.gmra.mxu0 %vm449_vm0, %v300_v5  ;;  %2837 = vmatprep.subr.bf16.mxu1 %v3068_v20 }
  0x47   : > { %2772 = vmatprep.mubr.msk.bf16.mxu0 %vm449_vm0, %v302_v6  ;;  %1786 = vmatpush1.bf16.msra.mxu0 %v2929_v37 }
  0x48   : > { %1787 = vmatprep.subr.bf16.mxu0 %v3068_v20 }
  0x49   : > { %2846 = vmatpush1.bf16.msra.mxu1 %v2932_v0 }
  0x4a   : > { %2838 = vmatprep.subr.bf16.mxu1 %v3068_v20 }
  0x4b   : > { %1788 = vmatpush1.bf16.msra.mxu0 %v2930_v43 }
  0x4c   : > { %1789 = vmatprep.subr.bf16.mxu0 %v3068_v20 }
  0x4e   : > { %2773 = vmatmul.mubr.msk.bf16.gmra.mxu0 %vm449_vm0, %v304_v7 }
  0x4f   : > { %2776 = vmatprep.mubr.msk.bf16.mxu0 %vm449_vm0, %v306_v8  ;;  %1790 = vmatpush1.bf16.msra.mxu0 %v2931_v53 }
  0x50   : > { %1791 = vmatprep.subr.bf16.mxu0 %v3068_v20 }
  0x53   : > { %1792 = vmatpush1.bf16.msra.mxu0 %v2932_v0  ;;  %v2937_v0 = vld [vmem:[%s4239_s3 + $0x40] sm:$0xff]  }
  0x54   : > { %1793 = vmatprep.subr.bf16.mxu0 %v3068_v20 }
  0x56   : > { %2777 = vmatmul.mubr.msk.bf16.gmra.mxu0 %vm449_vm0, %v308_v9 }
  0x57   : > { %2780 = vmatprep.mubr.msk.bf16.mxu0 %vm449_vm0, %v310_v10 }
  0x5e   : > { %2781 = vmatmul.mubr.msk.bf16.gmra.mxu0 %vm449_vm0, %v312_v11 }
  0x5f   : > { %2784 = vmatprep.mubr.msk.bf16.mxu0 %vm449_vm0, %v314_v12 }
  0x66   : > { %2785 = vmatmul.mubr.msk.bf16.gmra.mxu0 %vm449_vm0, %v316_v13  ;;  %v2933_v13 = vld [vmem:[%s4239_s3 + $0x18] sm:$0xff]  }
  0x67   : > { %2788 = vmatprep.mubr.msk.bf16.mxu0 %vm449_vm0, %v318_v14  ;;  %1794 = vmatpush1.bf16.msra.mxu0 %v2933_v13 }
  0x68   : > { %2847 = vmatpush1.bf16.msra.mxu1 %v2933_v13  ;;  %1795 = vmatprep.subr.bf16.mxu0 %v3068_v20 }
  0x69   : > { %2839 = vmatprep.subr.bf16.mxu1 %v3068_v20 }
  0x6b   : > { %1796 = vmatpush1.bf16.msra.mxu0 %v2934_v26 }
  0x6c   : > { %2848 = vmatpush1.bf16.msra.mxu1 %v2934_v26  ;;  %1797 = vmatprep.subr.bf16.mxu0 %v3068_v20 }
  0x6d   : > { %2840 = vmatprep.subr.bf16.mxu1 %v3068_v20 }
  0x6e   : > { %2789 = vmatmul.mubr.msk.bf16.gmra.mxu0 %vm449_vm0, %v320_v15 }
  0x6f   : > { %2792 = vmatprep.mubr.msk.bf16.mxu0 %vm449_vm0, %v322_v16 }
  0x76   : > { %2793 = vmatmul.mubr.msk.bf16.gmra.mxu0 %vm449_vm0, %v324_v17 }
  0x77   : > { %2796 = vmatprep.mubr.msk.bf16.mxu0 %vm449_vm0, %v326_v18 }
  0x7e   : > { %2797 = vmatmul.mubr.msk.bf16.gmra.mxu0 %vm449_vm0, %v328_v19 }
 0x106   : > { %v2770_v35 = vpop.f32.mrf.mxu0 }
 0x107   : > { %v541_v39 = vadd.f32 %v2770_v35, %v3300_v36 }
 0x108   : > { %v532_v38 = vpop.f32.mrf.mxu0 }
 0x109   : > { %v533_v41 = vadd.f32 %v3300_v36, %v532_v38  ;;  %v661_v45 = vmax.f32 %v541_v39, 0.0 }
 0x10a   : > { %v2771_v40 = vpop.f32.mrf.mxu0 }
 0x10b   : > { %v544_v42 = vadd.f32 %v2771_v40, %v3300_v36  ;;  %v659_v49 = vmax.f32 %v533_v41, 0.0  ;;  %v2935_v40 = vld [vmem:[%s4239_s3 + $0x8] sm:$0xff]  }
 0x10c   : > { %v535_v44 = vpop.f32.mrf.mxu0  ;;  %1798 = vmatpush1.bf16.msra.mxu0 %v2935_v40  ;;  %2849 = vmatpush1.bf16.msra.mxu1 %v2935_v40 }
 0x10d   : > { %v662_v46 = vmax.f32 %v544_v42, 0.0  ;;  %v536_v47 = vadd.f32 %v3300_v36, %v535_v44  ;;  %1799 = vmatprep.subr.bf16.mxu0 %v3068_v20  ;;  %2841 = vmatprep.subr.bf16.mxu1 %v3068_v20 }
 0x10e   : > { %v2774_v48 = vpop.f32.mrf.mxu0 }
 0x10f   : > { %v692_v50 = vpack.c.bf16 %v662_v46, %v661_v45  ;;  %v660_v51 = vmax.f32 %v536_v47, 0.0  ;;  %v557_v52 = vadd.f32 %v2774_v48, %v3300_v36 }
 0x110   : > { %v548_v54 = vpop.f32.mrf.mxu0 }
 0x111   : > { %v722_v55 = vshrl.u32 %v692_v50, 16  ;;  %v691_v56 = vpack.c.bf16 %v660_v51, %v659_v49  ;;  %v725_v57 = vshll.u32 %v692_v50, 16  ;;  %v549_v58 = vadd.f32 %v3300_v36, %v548_v54 }
 0x112   : > { %v2775_v59 = vpop.f32.mrf.mxu0  ;;  %v665_v62 = vmax.f32 %v557_v52, 0.0 }
 0x113   : > { %v724_v60 = vrot.slane %v722_v55, 7  ;;  %v715_v61 = vshrl.u32 %v691_v56, 16  ;;  %v560_v63 = vadd.f32 %v2775_v59, %v3300_v36  ;;  %v718_v1 = vshll.u32 %v691_v56, 16  ;;  %v2936_v55 = vld [vmem:[%s4239_s3] sm:$0xff]  }
 0x114   : > { %v663_v2 = vmax.f32 %v549_v58, 0.0  ;;  %v551_v3 = vpop.f32.mrf.mxu0  ;;  %1800 = vmatpush1.bf16.msra.mxu0 %v2936_v55  ;;  %2850 = vmatpush1.bf16.msra.mxu1 %v2936_v55 }
 0x115   : > { %v727_v4 = vor.u32 %v725_v57, %v724_v60  ;;  %v717_v5 = vrot.slane %v715_v61, 7  ;;  %v666_v6 = vmax.f32 %v560_v63, 0.0  ;;  %v552_v7 = vadd.f32 %v3300_v36, %v551_v3  ;;  %1815 = vmatprep.subr.bf16.mxu0 %v3068_v20  ;;  %2842 = vmatprep.subr.bf16.mxu1 %v3068_v20 }
 0x116   : > { %v3330_v8 = vsel %vm3274_vm3, %v724_v60, 0  ;;  %v2778_v16 = vpop.f32.mrf.mxu0 }
 0x117   : > { %v720_v9 = vor.u32 %v718_v1, %v717_v5  ;;  %v694_v10 = vpack.c.bf16 %v666_v6, %v665_v62  ;;  %v664_v11 = vmax.f32 %v552_v7, 0.0  ;;  %v3336_v12 = vsel %vm3274_vm3, 0, %v727_v4 }
 0x118   : > { %1254 = vrot.lane.b32.xlu1 %v3336_v12, %s3071_s23  ;;  %v1129_v14 = vrot.slane %v3336_v12, 1  ;;  %v1130_v15 = vrot.slane %v3330_v8, 1  ;;  %v3359_v27 = vpop.f32.mrf.mxu0  ;;  %v925_v29 = vshll.u32 %v3336_v12, 16  ;;  %v881_v31 = vsel %vm3274_vm3, %v717_v5, 0  ;;  %1816 = vmatpush2.bf16.msra.mxu0 %v2937_v0 }
 0x119   : > { %v693_v17 = vpack.c.bf16 %v664_v11, %v663_v2  ;;  %v736_v18 = vshrl.u32 %v694_v10, 16  ;;  %v3352_v25 = vsel %vm3274_vm3, 0, %v720_v9  ;;  %v739_v33 = vshll.u32 %v694_v10, 16  ;;  %2851 = vmatpush2.bf16.msra.mxu1 %v2937_v0 }
 0x11a   : > { %v1131_v19 = vsel %vm1122_vm4, %v1129_v14, %v1130_v15  ;;  %v1126_v35 = vrot.slane %v3352_v25, 1  ;;  %v927_v39 = vrot.slane %v925_v29, 1  ;;  %v573_v41 = vadd.f32 %v2778_v16, %v3300_v36  ;;  %v2779_v42 = vpop.f32.mrf.mxu0 }
 0x11b   : > { %v729_v21 = vshrl.u32 %v693_v17, 16  ;;  %v732_v24 = vshll.u32 %v693_v17, 16  ;;  %1318 = vrot.lane.b32.xlu0 %v1131_v19, %s3072_s29  ;;  %2618 = vmatprep.mubr.msk.bf16.mxu0 %vm1412_vm6, %v1131_v19  ;;  %v738_v32 = vrot.slane %v736_v18, 7  ;;  %v1127_v43 = vrot.slane %v881_v31, 1 }
 0x11c   : > { %1348 = vrot.lane.b32.xlu1 %v3336_v12, %s3073_s12  ;;  %v576_v46 = vadd.f32 %v2779_v42, %v3300_v36  ;;  %v923_v47 = vshrl.u32 %v3336_v12, 16  ;;  %v930_v48 = vshll.u32 %v3330_v8, 16  ;;  %v913_v52 = vshll.u32 %v3352_v25, 16  ;;  %v567_v11 = vpop.f32.mrf.mxu0 }
 0x11d   : > { %v731_v30 = vrot.slane %v729_v21, 7  ;;  %v741_v49 = vor.u32 %v739_v33, %v738_v32  ;;  %v1128_v50 = vsel %vm1122_vm4, %v1126_v35, %v1127_v43  ;;  %v669_v57 = vmax.f32 %v573_v41, 0.0 }
 0x11e   : > { %v928_v53 = vor.u32 %v927_v39, %v923_v47  ;;  %v932_v56 = vrot.slane %v930_v48, 1  ;;  %v670_v58 = vmax.f32 %v576_v46, 0.0  ;;  %v915_v60 = vrot.slane %v913_v52, 1  ;;  %v2782_v13 = vpop.f32.mrf.mxu0 }
 0x11f   : > { %v734_v37 = vor.u32 %v732_v24, %v731_v30  ;;  %1224 = vrot.lane.b32.xlu0 %v1131_v19, %s3069_s8  ;;  %v3370_v38 = vsel %vm3274_vm3, %v731_v30, 0  ;;  %v3403_v59 = vsel %vm3274_vm3, 0, %v741_v49  ;;  %v911_v62 = vshrl.u32 %v3352_v25, 16 }
 0x120   : > { %1252 = vrot.lane.b32.xlu1 %v3352_v25, %s3071_s23  ;;  %v1133_v44 = vrot.slane %v3370_v38, 1  ;;  %v933_v61 = vsel %vm897_vm5, %v928_v53, %v932_v56  ;;  %v918_v63 = vshll.u32 %v881_v31, 16  ;;  %v696_v1 = vpack.c.bf16 %v670_v58, %v669_v57  ;;  %v580_v18 = vpop.f32.mrf.mxu0 }
 0x121   : > { %v3381_v45 = vsel %vm3274_vm3, 0, %v734_v37  ;;  %v916_v2 = vor.u32 %v915_v60, %v911_v62  ;;  %v884_v3 = vsel %vm3274_vm3, %v738_v32, 0  ;;  %v1135_v7 = vrot.slane %v3403_v59, 1 }
 0x122   : > { %v1132_v51 = vrot.slane %v3381_v45, 1  ;;  %v920_v4 = vrot.slane %v918_v63, 1  ;;  %v750_v5 = vshrl.u32 %v696_v1, 16  ;;  %v1136_v8 = vrot.slane %v884_v3, 1  ;;  %v2783_v31 = vpop.f32.mrf.mxu0 }
 0x123   : > { %1222 = vrot.lane.b32.xlu0 %v1128_v50, %s3069_s8  ;;  %v753_v9 = vshll.u32 %v696_v1, 16  ;;  %v937_v15 = vshll.u32 %v3381_v45, 16  ;;  %v565_v16 = vadd.f32 %v3300_v36, %v3359_v27  ;;  %v568_v17 = vadd.f32 %v3300_v36, %v567_v11 }
 0x124   : > { %1316 = vrot.lane.b32.xlu1 %v1128_v50, %s3072_s29  ;;  %v3394_v54 = vsel %vm1122_vm4, %v1132_v51, %v1133_v44  ;;  %v921_v6 = vsel %vm897_vm5, %v916_v2, %v920_v4  ;;  %v752_v20 = vrot.slane %v750_v5, 7  ;;  %v3425_v10 = vsel %vm1122_vm4, %v1135_v7, %v1136_v8 }
 0x125   : > { %2619 = vmatprep.mubr.msk.bf16.mxu1 %vm1412_vm6, %v3394_v54  ;;  %v939_v21 = vrot.slane %v937_v15, 1  ;;  %v667_v24 = vmax.f32 %v565_v16, 0.0  ;;  %v668_v26 = vmax.f32 %v568_v17, 0.0  ;;  %v949_v27 = vshll.u32 %v3403_v59, 16 }
 0x126   : > { %v755_v14 = vor.u32 %v753_v9, %v752_v20  ;;  %v935_v29 = vshrl.u32 %v3381_v45, 16  ;;  %v942_v30 = vshll.u32 %v3370_v38, 16  ;;  %v589_v32 = vadd.f32 %v2782_v13, %v3300_v36 }
 0x127   : > { %1352 = vrot.lane.b32.xlu0 %v3403_v59, %s3073_s12  ;;  %v592_v33 = vadd.f32 %v2783_v31, %v3300_v36  ;;  %v695_v37 = vpack.c.bf16 %v668_v26, %v667_v24  ;;  %v947_v39 = vshrl.u32 %v3403_v59, 16  ;;  %v951_v40 = vrot.slane %v949_v27, 1 }
 0x128   : > { %1286 = vrot.lane.b32.xlu1 %v933_v61, %s3074_s19  ;;  %v3440_v19 = vsel %vm3274_vm3, 0, %v755_v14  ;;  %v940_v35 = vor.u32 %v939_v21, %v935_v29  ;;  %v954_v41 = vshll.u32 %v884_v3, 16  ;;  %v944_v42 = vrot.slane %v942_v30, 1 }
 0x129   : > { %v673_v43 = vmax.f32 %v589_v32, 0.0  ;;  %v674_v38 = vmax.f32 %v592_v33, 0.0  ;;  %v743_v46 = vshrl.u32 %v695_v37, 16  ;;  %v952_v47 = vor.u32 %v951_v40, %v947_v39 }
 0x12a   : > { %v945_v44 = vsel %vm897_vm5, %v940_v35, %v944_v42  ;;  %v956_v48 = vrot.slane %v954_v41, 1  ;;  %v746_v51 = vshll.u32 %v695_v37, 16  ;;  %v886_v53 = vsel %vm3274_vm3, %v752_v20, 0 }
 0x12b   : > { %1258 = vrot.lane.b32.xlu0 %v3403_v59, %s3071_s23  ;;  %v698_v49 = vpack.c.bf16 %v674_v38, %v673_v43  ;;  %v745_v50 = vrot.slane %v743_v46, 7  ;;  %v1141_v56 = vrot.slane %v3440_v19, 1  ;;  %v1142_v57 = vrot.slane %v886_v53, 1 }
 0x12c   : > { %1192 = vrot.lane.b32.xlu1 %v933_v61, %s3070_s16  ;;  %v957_v52 = vsel %vm897_vm5, %v952_v47, %v956_v48  ;;  %v581_v0 = vadd.f32 %v3300_v36, %v580_v18  ;;  %v973_v15 = vshll.u32 %v3440_v19, 16  ;;  %v971_v26 = vshrl.u32 %v3440_v19, 16 }
 0x12d   : > { %v764_v55 = vshrl.u32 %v698_v49, 16  ;;  %v748_v58 = vor.u32 %v746_v51, %v745_v50  ;;  %v767_v60 = vshll.u32 %v698_v49, 16  ;;  %v3469_v62 = vsel %vm1122_vm4, %v1141_v56, %v1142_v57 }
 0x12e   : > { %v885_v4 = vsel %vm3274_vm3, %v745_v50, 0  ;;  %v975_v27 = vrot.slane %v973_v15, 1  ;;  %v978_v29 = vshll.u32 %v886_v53, 16 }
 0x12f   : > { %1190 = vrot.lane.b32.xlu0 %v921_v6, %s3070_s16  ;;  %v3475_v63 = vsel %vm3274_vm3, 0, %v748_v58  ;;  %v966_v11 = vshll.u32 %v885_v4, 16  ;;  %v1139_v14 = vrot.slane %v885_v4, 1 }
 0x130   : > { %1380 = vrot.lane.b32.xlu1 %v933_v61, %s3075_s18  ;;  %v583_v61 = vpop.f32.mrf.mxu0  ;;  %v961_v3 = vshll.u32 %v3475_v63, 16  ;;  %v959_v20 = vshrl.u32 %v3475_v63, 16  ;;  %v1138_v13 = vrot.slane %v3475_v63, 1  ;;  %v976_v37 = vor.u32 %v975_v27, %v971_v26 }
 0x131   : > { %v584_v1 = vadd.f32 %v3300_v36, %v583_v61  ;;  %v968_v21 = vrot.slane %v966_v11, 1  ;;  %v980_v39 = vrot.slane %v978_v29, 1 }
 0x132   : > { %v2786_v5 = vpop.f32.mrf.mxu0  ;;  %v963_v9 = vrot.slane %v961_v3, 1  ;;  %v3501_v24 = vsel %vm1122_vm4, %v1138_v13, %v1139_v14 }
 0x133   : > { %1322 = vrot.lane.b32.xlu0 %v3425_v10, %s3072_s29  ;;  %v672_v7 = vmax.f32 %v584_v1, 0.0  ;;  %v605_v31 = vadd.f32 %v2786_v5, %v3300_v36  ;;  %v981_v38 = vsel %vm897_vm5, %v976_v37, %v980_v39 }
 0x134   : > { %1284 = vrot.lane.b32.xlu1 %v921_v6, %s3074_s19  ;;  %v671_v6 = vmax.f32 %v581_v0, 0.0  ;;  %v596_v16 = vpop.f32.mrf.mxu0  ;;  %v964_v18 = vor.u32 %v963_v9, %v959_v20 }
 0x135   : > { %v677_v40 = vmax.f32 %v605_v31, 0.0 }
 0x136   : > { %v697_v17 = vpack.c.bf16 %v672_v7, %v671_v6  ;;  %v2787_v30 = vpop.f32.mrf.mxu0  ;;  %v969_v33 = vsel %vm897_vm5, %v964_v18, %v968_v21 }
 0x137   : > { %1228 = vrot.lane.b32.xlu0 %v3425_v10, %s3069_s8  ;;  %v608_v32 = vadd.f32 %v2787_v30, %v3300_v36 }
 0x138   : > { %1350 = vrot.lane.b32.xlu1 %v3381_v45, %s3073_s12  ;;  %v757_v35 = vshrl.u32 %v697_v17, 16  ;;  %v760_v43 = vshll.u32 %v697_v17, 16 }
 0x139   : > { %v678_v41 = vmax.f32 %v608_v32, 0.0 }
 0x13a   : > { %v759_v42 = vrot.slane %v757_v35, 7 }
 0x13b   : > { %1356 = vrot.lane.b32.xlu0 %v3440_v19, %s3073_s12  ;;  %v700_v46 = vpack.c.bf16 %v678_v41, %v677_v40  ;;  %v3564_v40 = vpop.permute.xlu1 %1220 }
 0x13c   : > { %1256 = vrot.lane.b32.xlu1 %v3381_v45, %s3071_s23  ;;  %v762_v50 = vor.u32 %v760_v43, %v759_v42  ;;  %v887_v4 = vsel %vm3274_vm3, %v759_v42, 0 }
 0x13d   : > { %v778_v51 = vshrl.u32 %v700_v46, 16  ;;  %v781_v61 = vshll.u32 %v700_v46, 16  ;;  %v990_v13 = vshll.u32 %v887_v4, 16 }
 0x13e   : > { %v3529_v58 = vsel %vm3274_vm3, 0, %v762_v50 }
 0x13f   : > { %1262 = vrot.lane.b32.xlu0 %v3440_v19, %s3071_s23  ;;  %v985_v3 = vshll.u32 %v3529_v58, 16  ;;  %v983_v9 = vshrl.u32 %v3529_v58, 16  ;;  %v1144_v15 = vrot.slane %v3529_v58, 1  ;;  %v992_v26 = vrot.slane %v990_v13, 1 }
 0x140   : > { %1320 = vrot.lane.b32.xlu1 %v3394_v54, %s3072_s29 }
 0x141   : > { %v987_v11 = vrot.slane %v985_v3, 1 }
 0x143   : > { %1382 = vrot.lane.b32.xlu0 %v945_v44, %s3075_s18  ;;  %v988_v21 = vor.u32 %v987_v11, %v983_v9 }
 0x144   : > { %1226 = vrot.lane.b32.xlu1 %v3394_v54, %s3069_s8  ;;  %v766_v54 = vrot.slane %v764_v55, 7 }
 0x145   : > { %v993_v31 = vsel %vm897_vm5, %v988_v21, %v992_v26 }
 0x146   : > { %v769_v2 = vor.u32 %v767_v60, %v766_v54  ;;  %v780_v60 = vrot.slane %v778_v51, 7 }
 0x147   : > { %1288 = vrot.lane.b32.xlu0 %v945_v44, %s3074_s19 }
 0x148   : > { %1384 = vrot.lane.b32.xlu1 %v957_v52, %s3075_s18  ;;  %v3489_v8 = vsel %vm3274_vm3, 0, %v769_v2  ;;  %v783_v6 = vor.u32 %v781_v61, %v780_v60 }
 0x149   : > { %v1147_v47 = vrot.slane %v3489_v8, 1  ;;  %v997_v49 = vshll.u32 %v3489_v8, 16  ;;  %v995_v55 = vshrl.u32 %v3489_v8, 16 }
 0x14a   : > { %v3549_v18 = vsel %vm3274_vm3, 0, %v783_v6 }
 0x14b   : > { %1194 = vrot.lane.b32.xlu0 %v945_v44, %s3070_s16  ;;  %v888_v44 = vsel %vm3274_vm3, %v766_v54, 0  ;;  %v999_v56 = vrot.slane %v997_v49, 1  ;;  %v597_v54 = vadd.f32 %v3300_v36, %v596_v16  ;;  %v1145_v16 = vrot.slane %v887_v4, 1 }
 0x14c   : > { %1290 = vrot.lane.b32.xlu1 %v957_v52, %s3074_s19  ;;  %v1148_v48 = vrot.slane %v888_v44, 1  ;;  %v1002_v57 = vshll.u32 %v888_v44, 16  ;;  %v3574_v44 = vpop.permute.xlu1 %1188  ;;  %v1021_v51 = vshll.u32 %v3549_v18, 16  ;;  %v1019_v61 = vshrl.u32 %v3549_v18, 16 }
 0x14d   : > { %v1000_v1 = vor.u32 %v999_v56, %v995_v55  ;;  %v675_v5 = vmax.f32 %v597_v54, 0.0  ;;  %v3554_v29 = vsel %vm1122_vm4, %v1144_v15, %v1145_v16  ;;  %v890_v55 = vsel %vm3274_vm3, %v780_v60, 0 }
 0x14e   : > { %v3522_v53 = vsel %vm1122_vm4, %v1147_v47, %v1148_v48  ;;  %v1004_v2 = vrot.slane %v1002_v57, 1  ;;  %v1153_v3 = vrot.slane %v3549_v18, 1  ;;  %v1154_v60 = vrot.slane %v890_v55, 1 }
 0x14f   : > { %1326 = vrot.lane.b32.xlu0 %v3469_v62, %s3072_s29 }
 0x150   : > { %1196 = vrot.lane.b32.xlu1 %v957_v52, %s3070_s16  ;;  %v599_v52 = vpop.f32.mrf.mxu0  ;;  %v1005_v20 = vsel %vm897_vm5, %v1000_v1, %v1004_v2  ;;  %v1026_v1 = vshll.u32 %v890_v55, 16  ;;  %v3609_v15 = vsel %vm1122_vm4, %v1153_v3, %v1154_v60 }
 0x151   : > { %v600_v0 = vadd.f32 %v3300_v36, %v599_v52 }
 0x152   : > { %v2790_v14 = vpop.f32.mrf.mxu0  ;;  %v1028_v13 = vrot.slane %v1026_v1, 1 }
 0x153   : > { %1232 = vrot.lane.b32.xlu0 %v3469_v62, %s3069_s8  ;;  %v676_v7 = vmax.f32 %v600_v0, 0.0  ;;  %v621_v37 = vadd.f32 %v2790_v14, %v3300_v36  ;;  %v1023_v0 = vrot.slane %v1021_v51, 1 }
 0x154   : > { %1354 = vrot.lane.b32.xlu1 %v3475_v63, %s3073_s12  ;;  %v612_v27 = vpop.f32.mrf.mxu0 }
 0x155   : > { %v699_v17 = vpack.c.bf16 %v676_v7, %v675_v5  ;;  %v681_v42 = vmax.f32 %v621_v37, 0.0  ;;  %v613_v4 = vadd.f32 %v3300_v36, %v612_v27  ;;  %v1024_v11 = vor.u32 %v1023_v0, %v1019_v61 }
 0x156   : > { %v2791_v32 = vpop.f32.mrf.mxu0 }
 0x157   : > { %1360 = vrot.lane.b32.xlu0 %v3489_v8, %s3073_s12  ;;  %v771_v30 = vshrl.u32 %v699_v17, 16  ;;  %v774_v35 = vshll.u32 %v699_v17, 16  ;;  %v624_v39 = vadd.f32 %v2791_v32, %v3300_v36  ;;  %v679_v16 = vmax.f32 %v613_v4, 0.0 }
 0x158   : > { %1260 = vrot.lane.b32.xlu1 %v3475_v63, %s3071_s23  ;;  %v615_v46 = vpop.f32.mrf.mxu0  ;;  %v1029_v32 = vsel %vm897_vm5, %v1024_v11, %v1028_v13 }
 0x159   : > { %v682_v43 = vmax.f32 %v624_v39, 0.0  ;;  %v616_v5 = vadd.f32 %v3300_v36, %v615_v46 }
 0x15a   : > { %v2794_v52 = vpop.f32.mrf.mxu0 }
 0x15b   : > { %1266 = vrot.lane.b32.xlu0 %v3489_v8, %s3071_s23  ;;  %v702_v48 = vpack.c.bf16 %v682_v43, %v681_v42  ;;  %v680_v17 = vmax.f32 %v616_v5, 0.0  ;;  %v637_v27 = vadd.f32 %v2794_v52, %v3300_v36 }
 0x15c   : > { %1324 = vrot.lane.b32.xlu1 %v3501_v24, %s3072_s29  ;;  %v628_v2 = vpop.f32.mrf.mxu0 }
 0x15d   : > { %v792_v56 = vshrl.u32 %v702_v48, 16  ;;  %v795_v7 = vshll.u32 %v702_v48, 16 }
 0x15e   : > { %v2795_v14 = vpop.f32.mrf.mxu0 }
 0x15f   : > { %1386 = vrot.lane.b32.xlu0 %v969_v33, %s3075_s18  ;;  %v794_v6 = vrot.slane %v792_v56, 7 }
 0x160   : > { %1230 = vrot.lane.b32.xlu1 %v3501_v24, %s3069_s8 }
 0x161   : > { %v797_v21 = vor.u32 %v795_v7, %v794_v6  ;;  %v631_v7 = vpop.f32.mrf.mxu0 }
 0x163   : > { %1292 = vrot.lane.b32.xlu0 %v969_v33, %s3074_s19  ;;  %v3626_v39 = vsel %vm3274_vm3, 0, %v797_v21 }
 0x164   : > { %1388 = vrot.lane.b32.xlu1 %v981_v38, %s3075_s18  ;;  %v1159_v11 = vrot.slane %v3626_v39, 1 }
 0x167   : > { %1198 = vrot.lane.b32.xlu0 %v969_v33, %s3070_s16  ;;  %v773_v33 = vrot.slane %v771_v30, 7  ;;  %v640_v30 = vadd.f32 %v2795_v14, %v3300_v36 }
 0x168   : > { %1294 = vrot.lane.b32.xlu1 %v981_v38, %s3074_s19 }
 0x169   : > { %v776_v41 = vor.u32 %v774_v35, %v773_v33  ;;  %v701_v35 = vpack.c.bf16 %v680_v17, %v679_v16  ;;  %v686_v42 = vmax.f32 %v640_v30, 0.0  ;;  %v632_v30 = vadd.f32 %v3300_v36, %v631_v7 }
 0x16b   : > { %1330 = vrot.lane.b32.xlu0 %v3522_v53, %s3072_s29  ;;  %v3578_v47 = vsel %vm3274_vm3, 0, %v776_v41  ;;  %v685_v41 = vmax.f32 %v637_v27, 0.0  ;;  %v788_v1 = vshll.u32 %v701_v35, 16  ;;  %v1414_v27 = vsel %vm1412_vm6, %v3280_v23, %v3574_v44 }
 0x16c   : > { %1200 = vrot.lane.b32.xlu1 %v981_v38, %s3070_s16  ;;  %v3571_v38 = vsel %vm3274_vm3, %v773_v33, 0  ;;  %v1150_v49 = vrot.slane %v3578_v47, 1  ;;  %v1009_v33 = vshll.u32 %v3578_v47, 16  ;;  %v1007_v46 = vshrl.u32 %v3578_v47, 16 }
 0x16d   : > { %v1151_v50 = vrot.slane %v3571_v38, 1  ;;  %v704_v52 = vpack.c.bf16 %v686_v42, %v685_v41  ;;  %v1447_v44 = vsel %vm1445_vm7, %v1414_v27, %v3564_v40 }
 0x16e   : > { %v1011_v48 = vrot.slane %v1009_v33, 1  ;;  %v2798_v33 = vpop.f32.mrf.mxu0 }
 0x16f   : > { %1236 = vrot.lane.b32.xlu0 %v3522_v53, %s3069_s8  ;;  %v3592_v54 = vsel %vm1122_vm4, %v1150_v49, %v1151_v50  ;;  %v1014_v49 = vshll.u32 %v3571_v38, 16  ;;  %v785_v50 = vshrl.u32 %v701_v35, 16  ;;  %v3642_v38 = vsel %vm3274_vm3, %v794_v6, 0 }
 0x170   : > { %1358 = vrot.lane.b32.xlu1 %v3529_v58, %s3073_s12  ;;  %v1012_v56 = vor.u32 %v1011_v48, %v1007_v46  ;;  %v806_v60 = vshrl.u32 %v704_v52, 16  ;;  %v1160_v13 = vrot.slane %v3642_v38, 1  ;;  %v629_v6 = vadd.f32 %v3300_v36, %v628_v2 }
 0x171   : > { %v1016_v61 = vrot.slane %v1014_v49, 1  ;;  %v787_v0 = vrot.slane %v785_v50, 7  ;;  %v809_v17 = vshll.u32 %v704_v52, 16  ;;  %v684_v49 = vmax.f32 %v632_v30, 0.0 }
 0x172   : > { %v3654_v16 = vrot.slane %v806_v60, 7  ;;  %v3662_v35 = vsel %vm1122_vm4, %v1159_v11, %v1160_v13  ;;  %v683_v41 = vmax.f32 %v629_v6, 0.0 }
 0x173   : > { %1204 = vrot.lane.b32.xlu0 %v1005_v20, %s3070_s16  ;;  %v1017_v5 = vsel %vm897_vm5, %v1012_v56, %v1016_v61  ;;  %v790_v14 = vor.u32 %v788_v1, %v787_v0  ;;  %v891_v52 = vsel %vm3274_vm3, %v787_v0, 0  ;;  %v644_v56 = vpop.f32.mrf.mxu0 }
 0x174   : > { %1264 = vrot.lane.b32.xlu1 %v3529_v58, %s3071_s23  ;;  %v811_v42 = vor.u32 %v809_v17, %v3654_v16  ;;  %v1157_v11 = vrot.slane %v891_v52, 1  ;;  %v703_v13 = vpack.c.bf16 %v684_v49, %v683_v41  ;;  %v1038_v27 = vshll.u32 %v891_v52, 16 }
 0x175   : > { %v3668_v2 = vsel %vm3274_vm3, 0, %v790_v14  ;;  %v2799_v6 = vpop.f32.mrf.mxu0 }
 0x176   : > { %v1033_v40 = vshll.u32 %v3668_v2, 16  ;;  %v1156_v7 = vrot.slane %v3668_v2, 1  ;;  %v799_v52 = vshrl.u32 %v703_v13, 16 }
 0x177   : > { %1364 = vrot.lane.b32.xlu0 %v3549_v18, %s3073_s12 }
 0x178   : > { %1328 = vrot.lane.b32.xlu1 %v3554_v29, %s3072_s29 }
 0x17b   : > { %1390 = vrot.lane.b32.xlu0 %v993_v31, %s3075_s18 }
 0x17c   : > { %1234 = vrot.lane.b32.xlu1 %v3554_v29, %s3069_s8 }
 0x17f   : > { %1296 = vrot.lane.b32.xlu0 %v993_v31, %s3074_s19 }
 0x180   : > { %1392 = vrot.lane.b32.xlu1 %v1005_v20, %s3075_s18 }
 0x183   : > { %1202 = vrot.lane.b32.xlu0 %v993_v31, %s3070_s16 }
 0x184   : > { %1298 = vrot.lane.b32.xlu1 %v1005_v20, %s3074_s19 }
 0x187   : > { %1268 = vrot.lane.b32.xlu0 %v3578_v47, %s3071_s23 }
 0x188   : > { %1270 = vrot.lane.b32.xlu1 %v3549_v18, %s3071_s23 }
 0x18a   : > { %v3589_v57 = vpop.permute.xlu1 %1254 }
 0x18b   : > { %1332 = vrot.lane.b32.xlu0 %v3592_v54, %s3072_s29 }
 0x18c   : > { %1362 = vrot.lane.b32.xlu1 %v3578_v47, %s3073_s12 }
 0x18d   : > { %v3602_v20 = vpop.permute.xlu0 %1318 }
 0x18e   : > { %v3604_v9 = vpop.permute.xlu1 %1348 }
 0x18f   : > { %1238 = vrot.lane.b32.xlu0 %v3592_v54, %s3069_s8 }
 0x190   : > { %1334 = vrot.lane.b32.xlu1 %v3609_v15, %s3072_s29 }
 0x191   : > { %v3613_v26 = vpop.permute.xlu0 %1224 }
 0x192   : > { %v1253_v31 = vpop.permute.xlu1 %1252 }
 0x193   : > { %1396 = vrot.lane.b32.xlu0 %v1029_v32, %s3075_s18  ;;  %v1480_v48 = vsel %vm1478_vm8, %v1447_v44, %v1253_v31  ;;  %v653_v44 = vadd.f32 %v2798_v33, %v3300_v36 }
 0x194   : > { %1240 = vrot.lane.b32.xlu1 %v3609_v15, %s3069_s8 }
 0x195   : > { %v3622_v37 = vpop.permute.xlu0 %1222 }
 0x196   : > { %v1317_v43 = vpop.permute.xlu1 %1316 }
 0x197   : > { %1302 = vrot.lane.b32.xlu0 %v1029_v32, %s3074_s19 }
 0x198   : > { %1368 = vrot.lane.b32.xlu1 %v3626_v39, %s3073_s12 }
 0x199   : > { %v3633_v51 = vpop.permute.xlu0 %1352 }
 0x19a   : > { %v3635_v55 = vpop.permute.xlu1 %1286 }
 0x19b   : > { %1208 = vrot.lane.b32.xlu0 %v1029_v32, %s3070_s16 }
 0x19c   : > { %1274 = vrot.lane.b32.xlu1 %v3626_v39, %s3071_s23 }
 0x19d   : > { %v3644_v3 = vpop.permute.xlu0 %1258 }
 0x19e   : > { %v3646_v4 = vpop.permute.xlu1 %1192 }
 0x19f   : > { %1394 = vrot.lane.b32.xlu0 %v1017_v5, %s3075_s18 }
 0x1a0   : > { %1206 = vrot.lane.b32.xlu1 %v1017_v5, %s3070_s16 }
 0x1a1   : > { %v1191_v21 = vpop.permute.xlu0 %1190 }
 0x1a2   : > { %v1381_v32 = vpop.permute.xlu1 %1380  ;;  %v1416_v1 = vsel %vm1412_vm6, %v3352_v25, %v1191_v21  ;;  %v1035_v21 = vrot.slane %v1033_v40, 1  ;;  %v1040_v40 = vrot.slane %v1038_v27, 1 }
 0x1a3   : > { %1300 = vrot.lane.b32.xlu0 %v1017_v5, %s3074_s19  ;;  %v3693_v5 = vsel %vm3274_vm3, 0, %v811_v42  ;;  %v1449_v17 = vsel %vm1445_vm7, %v1416_v1, %v3622_v37  ;;  %v656_v37 = vadd.f32 %v2799_v6, %v3300_v36 }
 0x1a4   : > { %1338 = vrot.lane.b32.xlu1 %v3662_v35, %s3072_s29  ;;  %v1482_v41 = vsel %vm1478_vm8, %v1449_v17, %v3589_v57  ;;  %v689_v57 = vmax.f32 %v653_v44, 0.0 }
 0x1a5   : > { %v3673_v46 = vpop.permute.xlu0 %1322  ;;  %v1514_v33 = vsel %vm449_vm0, %v1482_v41, %v3635_v55  ;;  %v645_v55 = vadd.f32 %v3300_v36, %v644_v56 }
 0x1a6   : > { %v1285_v50 = vpop.permute.xlu1 %1284  ;;  %v1547_v17 = vsel %vm1543_vm10, %v1514_v33, %v3602_v20 }
 0x1a7   : > { %v1512_v61 = vsel %vm449_vm0, %v1480_v48, %v1285_v50  ;;  %1366 = vrot.lane.b32.xlu0 %v3668_v2, %s3073_s12  ;;  %v1043_v48 = vshrl.u32 %v3626_v39, 16  ;;  %v1050_v50 = vshll.u32 %v3642_v38, 16  ;;  %v687_v56 = vmax.f32 %v645_v55, 0.0 }
 0x1a8   : > { %v1545_v31 = vsel %vm1543_vm10, %v1512_v61, %v1317_v43  ;;  %1244 = vrot.lane.b32.xlu1 %v3662_v35, %s3069_s8  ;;  %v1045_v43 = vshll.u32 %v3626_v39, 16 }
 0x1a9   : > { %v1578_v0 = vsel %vm1576_vm9, %v1545_v31, %v3604_v9  ;;  %v3689_v60 = vpop.permute.xlu0 %1228  ;;  %v1031_v9 = vshrl.u32 %v3668_v2, 16  ;;  %v690_v31 = vmax.f32 %v656_v37, 0.0  ;;  %v1052_v38 = vrot.slane %v1050_v50, 1 }
 0x1aa   : > { %v1351_v14 = vpop.permute.xlu1 %1350  ;;  %v1611_v25 = vsel %vm1609_vm11, %v1578_v0, %v1381_v32  ;;  %v3708_v32 = vsel %vm1122_vm4, %v1156_v7, %v1157_v11  ;;  %v1047_v49 = vrot.slane %v1045_v43, 1  ;;  %v647_v0 = vpop.f32.mrf.mxu0  ;;  %v802_v43 = vshll.u32 %v703_v13, 16 }
 0x1ab   : > { %1818 = vmatmul.mubr.bf16.vlgmr.msra.gmra.mxu0 %v1611_v25  ;;  %1272 = vrot.lane.b32.xlu0 %v3668_v2, %s3071_s23  ;;  %v1036_v61 = vor.u32 %v1035_v21, %v1031_v9  ;;  %v801_v25 = vrot.slane %v799_v52, 7  ;;  %v648_v9 = vadd.f32 %v3300_v36, %v647_v0  ;;  %v1418_v21 = vsel %vm1412_vm6, %v3336_v12, %v3646_v4 }
 0x1ac   : > { %1372 = vrot.lane.b32.xlu1 %v3693_v5, %s3073_s12  ;;  %v1048_v11 = vor.u32 %v1047_v49, %v1043_v48  ;;  %v1580_v13 = vsel %vm1576_vm9, %v1547_v17, %v1351_v14  ;;  %v706_v44 = vpack.c.bf16 %v690_v31, %v689_v57  ;;  %v1451_v36 = vsel %vm1445_vm7, %v1418_v21, %v3613_v26 }
 0x1ad   : > { %v3705_v30 = vpop.permute.xlu0 %1356  ;;  %v1041_v6 = vsel %vm897_vm5, %v1036_v61, %v1040_v40  ;;  %v804_v20 = vor.u32 %v802_v43, %v801_v25  ;;  %v688_v12 = vmax.f32 %v648_v9, 0.0  ;;  %v3747_v4 = vsel %vm3274_vm3, %v3654_v16, 0 }
 0x1ae   : > { %v1257_v42 = vpop.permute.xlu1 %1256  ;;  %v1053_v41 = vsel %vm897_vm5, %v1048_v11, %v1052_v38  ;;  %v820_v50 = vshrl.u32 %v706_v44, 16  ;;  %v1165_v40 = vrot.slane %v3693_v5, 1  ;;  %v823_v31 = vshll.u32 %v706_v44, 16 }
 0x1af   : > { %1336 = vrot.lane.b32.xlu0 %v3708_v32, %s3072_s29  ;;  %v1484_v14 = vsel %vm1478_vm8, %v1451_v36, %v1257_v42  ;;  %v705_v33 = vpack.c.bf16 %v688_v12, %v687_v56  ;;  %v3760_v42 = vsel %vm3274_vm3, 0, %v804_v20  ;;  %v1069_v12 = vshll.u32 %v3693_v5, 16 }
 0x1b0   : > { %1278 = vrot.lane.b32.xlu1 %v3693_v5, %s3071_s23  ;;  %v3762_v57 = vrot.slane %v820_v50, 7  ;;  %v1057_v43 = vshll.u32 %v3760_v42, 16  ;;  %v1055_v21 = vshrl.u32 %v3760_v42, 16  ;;  %v1162_v36 = vrot.slane %v3760_v42, 1 }
 0x1b1   : > { %v3722_v1 = vpop.permute.xlu0 %1262 }
 0x1b2   : > { %v1321_v7 = vpop.permute.xlu1 %1320  ;;  %v825_v17 = vor.u32 %v823_v31, %v3762_v57 }
 0x1b3   : > { %1242 = vrot.lane.b32.xlu0 %v3708_v32, %s3069_s8 }
 0x1b4   : > { %1398 = vrot.lane.b32.xlu1 %v1041_v6, %s3075_s18 }
 0x1b5   : > { %v1383_v27 = vpop.permute.xlu0 %1382 }
 0x1b6   : > { %v1227_v37 = vpop.permute.xlu1 %1226  ;;  %v1614_v48 = vsel %vm1609_vm11, %v1580_v13, %v1383_v27  ;;  %v1059_v13 = vrot.slane %v1057_v43, 1 }
 0x1b7   : > { %1400 = vrot.lane.b32.xlu0 %v1053_v41, %s3075_s18  ;;  %1826 = vmatmul.mubr.bf16.vlgmr.msra.gmra.mxu1 %v1614_v48  ;;  %v3790_v48 = vsel %vm3274_vm3, 0, %v825_v17 }
 0x1b8   : > { %1304 = vrot.lane.b32.xlu1 %v1041_v6, %s3074_s19  ;;  %2620 = vmatprep.mubr.msk.bf16.mxu1 %vm1412_vm6, %v3425_v10  ;;  %v1166_v10 = vrot.slane %v3747_v4, 1  ;;  %v1185_v22 = vrot.slane %v3790_v48, 1 }
 0x1b9   : > { %v1289_v49 = vpop.permute.xlu0 %1288 }
 0x1ba   : > { %v1516_v52 = vsel %vm449_vm0, %v1484_v14, %v1289_v49  ;;  %v1385_v61 = vpop.permute.xlu1 %1384  ;;  %v3767_v38 = vsel %vm1122_vm4, %v1165_v40, %v1166_v10 }
 0x1bb   : > { %v1549_v26 = vsel %vm1543_vm10, %v1516_v52, %v1321_v7  ;;  %1306 = vrot.lane.b32.xlu0 %v1053_v41, %s3074_s19 }
 0x1bc   : > { %1210 = vrot.lane.b32.xlu1 %v1041_v6, %s3070_s16  ;;  %v1582_v16 = vsel %vm1576_vm9, %v1549_v26, %v3633_v51  ;;  %v813_v51 = vshrl.u32 %v705_v33, 16  ;;  %v893_v6 = vsel %vm3274_vm3, %v801_v25, 0 }
 0x1bd   : > { %v1195_v0 = vpop.permute.xlu0 %1194  ;;  %v1617_v7 = vsel %vm1609_vm11, %v1582_v16, %v1385_v61  ;;  %v1062_v27 = vshll.u32 %v893_v6, 16  ;;  %v1163_v56 = vrot.slane %v893_v6, 1  ;;  %v1067_v61 = vshrl.u32 %v3693_v5, 16 }
 0x1be   : > { %v1291_v11 = vpop.permute.xlu1 %1290  ;;  %v1420_v44 = vsel %vm1412_vm6, %v3381_v45, %v1195_v0  ;;  %v1060_v45 = vor.u32 %v1059_v13, %v1055_v21 }
 0x1bf   : > { %1212 = vrot.lane.b32.xlu0 %v1053_v41, %s3070_s16  ;;  %1834 = vmatmul.mubr.bf16.gmra.mxu1 %v1617_v7  ;;  %v815_v41 = vrot.slane %v813_v51, 7  ;;  %v1453_v14 = vsel %vm1445_vm7, %v1420_v44, %v1227_v37  ;;  %v1064_v49 = vrot.slane %v1062_v27, 1  ;;  %v3805_v10 = vsel %vm1122_vm4, %v1162_v36, %v1163_v56 }
 0x1c0   : > { %1342 = vrot.lane.b32.xlu1 %v3767_v38, %s3072_s29  ;;  %2621 = vmatprep.mubr.msk.bf16.mxu1 %vm1412_vm6, %v3501_v24  ;;  %v816_v24 = vshll.u32 %v705_v33, 16  ;;  %v1486_v26 = vsel %vm1478_vm8, %v1453_v14, %v3644_v3  ;;  %v1071_v37 = vrot.slane %v1069_v12, 1  ;;  %v1074_v33 = vshll.u32 %v3747_v4, 16 }
 0x1c1   : > { %v3777_v55 = vpop.permute.xlu0 %1326  ;;  %v1065_v16 = vsel %vm897_vm5, %v1060_v45, %v1064_v49  ;;  %v1518_v3 = vsel %vm449_vm0, %v1486_v26, %v1291_v11  ;;  %v895_v6 = vsel %vm3274_vm3, %v815_v41, 0 }
 0x1c2   : > { %v1197_v9 = vpop.permute.xlu1 %1196  ;;  %v818_v50 = vor.u32 %v816_v24, %v815_v41  ;;  %v1072_v43 = vor.u32 %v1071_v37, %v1067_v61  ;;  %v1076_v51 = vrot.slane %v1074_v33, 1  ;;  %v1551_v17 = vsel %vm1543_vm10, %v1518_v3, %v3673_v46 }
 0x1c3   : > { %1370 = vrot.lane.b32.xlu0 %v3760_v42, %s3073_s12  ;;  %v1422_v11 = vsel %vm1412_vm6, %v3403_v59, %v1197_v9  ;;  %v1086_v46 = vshll.u32 %v895_v6, 16 }
 0x1c4   : > { %1248 = vrot.lane.b32.xlu1 %v3767_v38, %s3069_s8  ;;  %v3813_v31 = vsel %vm3274_vm3, 0, %v818_v50  ;;  %v1077_v44 = vsel %vm897_vm5, %v1072_v43, %v1076_v51  ;;  %v1455_v56 = vsel %vm1445_vm7, %v1422_v11, %v3689_v60  ;;  %v1174_v43 = vshll.u32 %v3790_v48, 16 }
 0x1c5   : > { %v3786_v25 = vpop.permute.xlu0 %1232  ;;  %v1081_v4 = vshll.u32 %v3813_v31, 16  ;;  %v1079_v41 = vshrl.u32 %v3813_v31, 16  ;;  %v1088_v49 = vrot.slane %v1086_v46, 1 }
 0x1c6   : > { %v1355_v20 = vpop.permute.xlu1 %1354 }
 0x1c7   : > { %1276 = vrot.lane.b32.xlu0 %v3760_v42, %s3071_s23  ;;  %v1584_v21 = vsel %vm1576_vm9, %v1551_v17, %v1355_v20  ;;  %v1083_v36 = vrot.slane %v1081_v4, 1 }
 0x1c8   : > { %1376 = vrot.lane.b32.xlu1 %v3790_v48, %s3073_s12 }
 0x1c9   : > { %v3799_v52 = vpop.permute.xlu0 %1360  ;;  %v1084_v45 = vor.u32 %v1083_v36, %v1079_v41 }
 0x1ca   : > { %v1261_v40 = vpop.permute.xlu1 %1260 }
 0x1cb   : > { %1340 = vrot.lane.b32.xlu0 %v3805_v10, %s3072_s29  ;;  %v1488_v59 = vsel %vm1478_vm8, %v1455_v56, %v1261_v40  ;;  %v1089_v26 = vsel %vm897_vm5, %v1084_v45, %v1088_v49 }
 0x1cc   : > { %1402 = vrot.lane.b32.xlu1 %v1065_v16, %s3075_s18 }
 0x1cd   : > { %v3817_v0 = vpop.permute.xlu0 %1266 }
 0x1ce   : > { %v1325_v7 = vpop.permute.xlu1 %1324 }
 0x1cf   : > { %1246 = vrot.lane.b32.xlu0 %v3805_v10, %s3069_s8 }
 0x1d0   : > { %1308 = vrot.lane.b32.xlu1 %v1065_v16, %s3074_s19 }
 0x1d1   : > { %v1387_v13 = vpop.permute.xlu0 %1386 }
 0x1d2   : > { %v1231_v27 = vpop.permute.xlu1 %1230  ;;  %v1620_v24 = vsel %vm1609_vm11, %v1584_v21, %v1387_v13  ;;  %v1172_v21 = vshrl.u32 %v3790_v48, 16  ;;  %v1176_v13 = vrot.slane %v1174_v43, 1 }
 0x1d3   : > { %1404 = vrot.lane.b32.xlu0 %v1077_v44, %s3075_s18  ;;  %1842 = vmatmul.mubr.bf16.gmra.mxu1 %v1620_v24 }
 0x1d4   : > { %1214 = vrot.lane.b32.xlu1 %v1065_v16, %s3070_s16  ;;  %2622 = vmatprep.mubr.msk.bf16.mxu1 %vm1412_vm6, %v3469_v62  ;;  %v1177_v41 = vor.u32 %v1176_v13, %v1172_v21 }
 0x1d5   : > { %v1293_v9 = vpop.permute.xlu0 %1292 }
 0x1d6   : > { %v1520_v20 = vsel %vm449_vm0, %v1488_v59, %v1293_v9  ;;  %v1389_v12 = vpop.permute.xlu1 %1388 }
 0x1d7   : > { %v1553_v14 = vsel %vm1543_vm10, %v1520_v20, %v1325_v7  ;;  %1310 = vrot.lane.b32.xlu0 %v1077_v44, %s3074_s19  ;;  %v1169_v7 = vrot.slane %v895_v6, 1 }
 0x1d8   : > { %1282 = vrot.lane.b32.xlu1 %v3790_v48, %s3071_s23  ;;  %v1586_v60 = vsel %vm1576_vm9, %v1553_v14, %v3705_v30  ;;  %v896_v30 = vsel %vm3274_vm3, %v3762_v57, 0 }
 0x1d9   : > { %v1199_v50 = vpop.permute.xlu0 %1198  ;;  %v1623_v62 = vsel %vm1609_vm11, %v1586_v60, %v1389_v12  ;;  %v1186_v57 = vrot.slane %v896_v30, 1  ;;  %v1179_v4 = vshll.u32 %v896_v30, 16  ;;  %v2938_v30 = vld [vmem:[%s4241_s5] sm:$0xff]  }
 0x1da   : > { %v1295_v61 = vpop.permute.xlu1 %1294  ;;  %v1424_v33 = vsel %vm1412_vm6, %v3475_v63, %v1199_v50  ;;  %2800 = vmatprep.subr.bf16.mxu0 %v2938_v30 }
 0x1db   : > { %1216 = vrot.lane.b32.xlu0 %v1077_v44, %s3070_s16  ;;  %1850 = vmatmul.mubr.bf16.gmra.mxu1 %v1623_v62  ;;  %v1457_v51 = vsel %vm1445_vm7, %v1424_v33, %v1231_v27  ;;  %v3881_v27 = vsel %vm1122_vm4, %v1185_v22, %v1186_v57  ;;  %v1181_v36 = vrot.slane %v1179_v4, 1 }
 0x1dc   : > { %1406 = vrot.lane.b32.xlu1 %v1089_v26, %s3075_s18  ;;  %2623 = vmatprep.mubr.msk.bf16.mxu1 %vm1412_vm6, %v3554_v29  ;;  %v1168_v29 = vrot.slane %v3813_v31, 1  ;;  %v1490_v17 = vsel %vm1478_vm8, %v1457_v51, %v3722_v1 }
 0x1dd   : > { %v3853_v40 = vpop.permute.xlu0 %1330  ;;  %v1522_v44 = vsel %vm449_vm0, %v1490_v17, %v1295_v61  ;;  %v1182_v20 = vsel %vm897_vm5, %v1177_v41, %v1181_v36  ;;  %2801 = vmatpush3.bf16.msra.mxu0 %v2938_v30 }
 0x1de   : > { %v1201_v37 = vpop.permute.xlu1 %1200  ;;  %v3875_v6 = vsel %vm1122_vm4, %v1168_v29, %v1169_v7  ;;  %v1555_v48 = vsel %vm1543_vm10, %v1522_v44, %v3777_v55 }
 0x1df   : > { %1374 = vrot.lane.b32.xlu0 %v3813_v31, %s3073_s12  ;;  %v1426_v46 = vsel %vm1412_vm6, %v3440_v19, %v1201_v37 }
 0x1e0   : > { %1312 = vrot.lane.b32.xlu1 %v1089_v26, %s3074_s19  ;;  %v1459_v55 = vsel %vm1445_vm7, %v1426_v46, %v3786_v25 }
 0x1e1   : > { %v3863_v16 = vpop.permute.xlu0 %1236 }
 0x1e2   : > { %v1359_v3 = vpop.permute.xlu1 %1358 }
 0x1e3   : > { %1280 = vrot.lane.b32.xlu0 %v3813_v31, %s3071_s23  ;;  %v1588_v56 = vsel %vm1576_vm9, %v1555_v48, %v1359_v3 }
 0x1e4   : > { %1218 = vrot.lane.b32.xlu1 %v1089_v26, %s3070_s16  ;;  %s3076_s16 = smov [#allocation5]  }
 0x1e5   : > { %v1205_v63 = vpop.permute.xlu0 %1204  ;;  %s3003_s23 = sshll.u32 %s3076_s16, 4  ;;  %s3004_s23 = int_to_ptr.vmem [resolvable:$false] %s3003_s23 }
 0x1e6   : > { %v1265_v11 = vpop.permute.xlu1 %1264 }
 0x1e7   : > { %1344 = vrot.lane.b32.xlu0 %v3875_v6, %s3072_s29 }
 0x1e8   : > { %1346 = vrot.lane.b32.xlu1 %v3881_v27, %s3072_s29  ;;  %s3005_s29 = scalar_lea.vmem %s3004_s23, 4096 }
 0x1e9   : > { %v3886_v24 = vpop.permute.xlu0 %1364 }
 0x1ea   : > { %v1329_v1 = vpop.permute.xlu1 %1328 }
 0x1eb   : > { %1250 = vrot.lane.b32.xlu0 %v3875_v6, %s3069_s8 }
 0x1ec   : > { %1410 = vrot.lane.b32.xlu1 %v3293_v34, %s3075_s18  ;;  %v1492_v34 = vsel %vm1478_vm8, %v1459_v55, %v1265_v11  ;;  %v1430_v11 = vsel %vm1412_vm6, %v3489_v8, %v1205_v63 }
 0x1ed   : > { %v1391_v59 = vpop.permute.xlu0 %1390 }
 0x1ee   : > { %v1235_v9 = vpop.permute.xlu1 %1234  ;;  %v1626_v12 = vsel %vm1609_vm11, %v1588_v56, %v1391_v59 }
 0x1ef   : > { %1408 = vrot.lane.b32.xlu0 %v1182_v20, %s3075_s18  ;;  %1858 = vmatmul.mubr.bf16.gmra.mxu1 %v1626_v12  ;;  %s4185_s18 = scalar_lea.hbm %s4243_s7, %s2722_s11 }
 0x1f0   : > { %2624 = vmatprep.mubr.msk.bf16.mxu1 %vm1412_vm6, %v3522_v53 }
 0x1f1   : > { %v1297_v19 = vpop.permute.xlu0 %1296 }
 0x1f2   : > { %v1524_v14 = vsel %vm449_vm0, %v1492_v34, %v1297_v19  ;;  %v1393_v45 = vpop.permute.xlu1 %1392 }
 0x1f3   : > { %v1557_v49 = vsel %vm1543_vm10, %v1524_v14, %v1329_v1  ;;  %1314 = vrot.lane.b32.xlu0 %v1182_v20, %s3074_s19 }
 0x1f4   : > { %v1590_v60 = vsel %vm1576_vm9, %v1557_v49, %v3799_v52 }
 0x1f5   : > { %v1203_v50 = vpop.permute.xlu0 %1202  ;;  %v1629_v62 = vsel %vm1609_vm11, %v1590_v60, %v1393_v45 }
 0x1f6   : > { %v1299_v25 = vpop.permute.xlu1 %1298  ;;  %v1428_v3 = vsel %vm1412_vm6, %v3529_v58, %v1203_v50 }
 0x1f7   : > { %1378 = vrot.lane.b32.xlu0 %v3280_v23, %s3073_s12  ;;  %1866 = vmatmul.mubr.bf16.gmra.mxu1 %v1629_v62  ;;  %v1461_v7 = vsel %vm1445_vm7, %v1428_v3, %v1235_v9 }
 0x1f8   : > { %2625 = vmatprep.mubr.msk.bf16.mxu1 %vm1412_vm6, %v3592_v54  ;;  %v1494_v43 = vsel %vm1478_vm8, %v1461_v7, %v3817_v0  ;;  %v1463_v0 = vsel %vm1445_vm7, %v1430_v11, %v3863_v16 }
 0x1f9   : > { %v1269_v53 = vpop.permute.xlu0 %1268  ;;  %v1526_v22 = vsel %vm449_vm0, %v1494_v43, %v1299_v25 }
 0x1fa   : > { %v1271_v61 = vpop.permute.xlu1 %1270  ;;  %v1559_v17 = vsel %vm1543_vm10, %v1526_v22, %v3853_v40  ;;  %v1496_v1 = vsel %vm1478_vm8, %v1463_v0, %v1269_v53 }
 0x1fd   : > { %v1333_v26 = vpop.permute.xlu0 %1332 }
 0x1fe   : > { %v1363_v37 = vpop.permute.xlu1 %1362 }
 0x1ff   : > { %v1592_v58 = vsel %vm1576_vm9, %v1559_v17, %v1363_v37 }
 0x201   : > { %v1239_v52 = vpop.permute.xlu0 %1238 }
 0x202   : > { %v1335_v33 = vpop.permute.xlu1 %1334 }
 0x205   : > { %v1397_v23 = vpop.permute.xlu0 %1396 }
 0x206   : > { %v1241_v29 = vpop.permute.xlu1 %1240 }
 0x209   : > { %v1303_v54 = vpop.permute.xlu0 %1302 }
 0x20a   : > { %v1369_v51 = vpop.permute.xlu1 %1368 }
 0x20d   : > { %v1209_v57 = vpop.permute.xlu0 %1208 }
 0x20e   : > { %v1275_v4 = vpop.permute.xlu1 %1274  ;;  %v1434_v19 = vsel %vm1412_vm6, %v3549_v18, %v1209_v57 }
 0x211   : > { %v1395_v21 = vpop.permute.xlu0 %1394 }
 0x212   : > { %v1207_v13 = vpop.permute.xlu1 %1206  ;;  %v1632_v44 = vsel %vm1609_vm11, %v1592_v58, %v1395_v21 }
 0x213   : > { %1874 = vmatmul.mubr.bf16.gmra.mxu1 %v1632_v44  ;;  %v1432_v48 = vsel %vm1412_vm6, %v3578_v47, %v1207_v13 }
 0x214   : > { %2626 = vmatprep.mubr.msk.bf16.mxu1 %vm1412_vm6, %v3609_v15  ;;  %v1465_v15 = vsel %vm1445_vm7, %v1432_v48, %v1239_v52 }
 0x215   : > { %v1301_v41 = vpop.permute.xlu0 %1300  ;;  %v1498_v20 = vsel %vm1478_vm8, %v1465_v15, %v1271_v61 }
 0x216   : > { %v1528_v40 = vsel %vm449_vm0, %v1496_v1, %v1301_v41  ;;  %v1339_v36 = vpop.permute.xlu1 %1338 }
 0x217   : > { %v1561_v8 = vsel %vm1543_vm10, %v1528_v40, %v1333_v26 }
 0x218   : > { %v1594_v63 = vsel %vm1576_vm9, %v1561_v8, %v3886_v24  ;;  %v1530_v24 = vsel %vm449_vm0, %v1498_v20, %v1303_v54 }
 0x219   : > { %v1367_v46 = vpop.permute.xlu0 %1366  ;;  %v1635_v16 = vsel %vm1609_vm11, %v1594_v63, %v1397_v23  ;;  %v1563_v47 = vsel %vm1543_vm10, %v1530_v24, %v1335_v33 }
 0x21a   : > { %v1245_v56 = vpop.permute.xlu1 %1244  ;;  %v1596_v14 = vsel %vm1576_vm9, %v1563_v47, %v1367_v46 }
 0x21b   : > { %1882 = vmatmul.mubr.bf16.gmra.mxu1 %v1635_v16 }
 0x21c   : > { %2627 = vmatprep.mubr.msk.bf16.mxu1 %vm1412_vm6, %v3708_v32  ;;  %v1467_v32 = vsel %vm1445_vm7, %v1434_v19, %v1241_v29 }
 0x21d   : > { %v1273_v59 = vpop.permute.xlu0 %1272 }
 0x21e   : > { %v1373_v9 = vpop.permute.xlu1 %1372  ;;  %v1500_v50 = vsel %vm1478_vm8, %v1467_v32, %v1273_v59 }
 0x221   : > { %v1337_v12 = vpop.permute.xlu0 %1336 }
 0x222   : > { %v1279_v55 = vpop.permute.xlu1 %1278 }
 0x225   : > { %v1243_v34 = vpop.permute.xlu0 %1242 }
 0x226   : > { %v1399_v45 = vpop.permute.xlu1 %1398 }
 0x227   : > { %v1638_v49 = vsel %vm1609_vm11, %v1596_v14, %v1399_v45 }
 0x228   : > { %1890 = vmatmul.mubr.bf16.gmra.mxu1 %v1638_v49 }
 0x229   : > { %2628 = vmatprep.mubr.msk.bf16.mxu1 %vm1412_vm6, %v3662_v35  ;;  %v1401_v60 = vpop.permute.xlu0 %1400 }
 0x22a   : > { %v1305_v62 = vpop.permute.xlu1 %1304 }
 0x22b   : > { %v1532_v25 = vsel %vm449_vm0, %v1500_v50, %v1305_v62 }
 0x22c   : > { %v1565_v53 = vsel %vm1543_vm10, %v1532_v25, %v1337_v12 }
 0x22d   : > { %v1307_v18 = vpop.permute.xlu0 %1306  ;;  %v1598_v61 = vsel %vm1576_vm9, %v1565_v53, %v1369_v51 }
 0x22e   : > { %v1211_v26 = vpop.permute.xlu1 %1210  ;;  %v1641_v37 = vsel %vm1609_vm11, %v1598_v61, %v1401_v60 }
 0x22f   : > { %v1436_v30 = vsel %vm1412_vm6, %v3668_v2, %v1211_v26  ;;  %v4012_v26 = vld [vmem:[%s4240_s4] ss:$0 sm:$0xff] }
 0x230   : > { %1898 = vmatmul.mubr.bf16.gmra.mxu1 %v1641_v37  ;;  %v1469_v33 = vsel %vm1445_vm7, %v1436_v30, %v1243_v34 }
 0x231   : > { %2629 = vmatprep.mubr.msk.bf16.mxu1 %vm1412_vm6, %v3805_v10  ;;  %v1213_v35 = vpop.permute.xlu0 %1212  ;;  %v1502_v29 = vsel %vm1478_vm8, %v1469_v33, %v1275_v4 }
 0x232   : > { %v1343_v52 = vpop.permute.xlu1 %1342  ;;  %v1534_v54 = vsel %vm449_vm0, %v1502_v29, %v1307_v18  ;;  %v1438_v2 = vsel %vm1412_vm6, %v3626_v39, %v1213_v35 }
 0x233   : > { %v1567_v51 = vsel %vm1543_vm10, %v1534_v54, %v1339_v36  ;;  %v1471_v11 = vsel %vm1445_vm7, %v1438_v2, %v1245_v56 }
 0x235   : > { %v1371_v3 = vpop.permute.xlu0 %1370 }
 0x236   : > { %v1249_v23 = vpop.permute.xlu1 %1248  ;;  %v1600_v10 = vsel %vm1576_vm9, %v1567_v51, %v1371_v3 }
 0x239   : > { %v1277_v7 = vpop.permute.xlu0 %1276 }
 0x23a   : > { %v1377_v43 = vpop.permute.xlu1 %1376  ;;  %v1504_v58 = vsel %vm1478_vm8, %v1471_v11, %v1277_v7 }
 0x23d   : > { %v1341_v22 = vpop.permute.xlu0 %1340 }
 0x23e   : > { %v1403_v57 = vpop.permute.xlu1 %1402 }
 0x23f   : > { %v1644_v17 = vsel %vm1609_vm11, %v1600_v10, %v1403_v57 }
 0x240   : > { %1906 = vmatmul.mubr.bf16.gmra.mxu1 %v1644_v17 }
 0x241   : > { %2630 = vmatprep.mubr.msk.bf16.mxu1 %vm1412_vm6, %v3767_v38  ;;  %v1247_v4 = vpop.permute.xlu0 %1246 }
 0x242   : > { %v1309_v21 = vpop.permute.xlu1 %1308 }
 0x243   : > { %v1536_v13 = vsel %vm449_vm0, %v1504_v58, %v1309_v21 }
 0x244   : > { %v1569_v44 = vsel %vm1543_vm10, %v1536_v13, %v1341_v22 }
 0x245   : > { %v1405_v39 = vpop.permute.xlu0 %1404  ;;  %v1602_v0 = vsel %vm1576_vm9, %v1569_v44, %v1373_v9 }
 0x246   : > { %v1215_v1 = vpop.permute.xlu1 %1214  ;;  %v1647_v41 = vsel %vm1609_vm11, %v1602_v0, %v1405_v39 }
 0x247   : > { %v1440_v40 = vsel %vm1412_vm6, %v3760_v42, %v1215_v1 }
 0x248   : > { %v1473_v36 = vsel %vm1445_vm7, %v1440_v40, %v1247_v4  ;;  %1914 = vmatmul.mubr.bf16.gmra.mxu1 %v1647_v41 }
 0x249   : > { %2631 = vmatprep.mubr.msk.bf16.mxu1 %vm1412_vm6, %v3875_v6  ;;  %v1311_v38 = vpop.permute.xlu0 %1310  ;;  %v1506_v8 = vsel %vm1478_vm8, %v1473_v36, %v1279_v55 }
 0x24a   : > { %v1283_v63 = vpop.permute.xlu1 %1282  ;;  %v1538_v46 = vsel %vm449_vm0, %v1506_v8, %v1311_v38 }
 0x24b   : > { %v1571_v16 = vsel %vm1543_vm10, %v1538_v46, %v1343_v52 }
 0x24d   : > { %v1217_v48 = vpop.permute.xlu0 %1216 }
 0x24e   : > { %v1407_v15 = vpop.permute.xlu1 %1406  ;;  %v1442_v9 = vsel %vm1412_vm6, %v3693_v5, %v1217_v48 }
 0x24f   : > { %v1475_v12 = vsel %vm1445_vm7, %v1442_v9, %v1249_v23 }
 0x251   : > { %v1375_v56 = vpop.permute.xlu0 %1374 }
 0x252   : > { %v1604_v59 = vsel %vm1576_vm9, %v1571_v16, %v1375_v56  ;;  %v1313_v20 = vpop.permute.xlu1 %1312 }
 0x253   : > { %v1650_v42 = vsel %vm1609_vm11, %v1604_v59, %v1407_v15 }
 0x254   : > { %1922 = vmatmul.mubr.bf16.gmra.mxu1 %v1650_v42 }
 0x255   : > { %2632 = vmatprep.mubr.msk.bf16.mxu1 %vm1412_vm6, %v3881_v27  ;;  %v1281_v6 = vpop.permute.xlu0 %1280 }
 0x256   : > { %v1508_v55 = vsel %vm1478_vm8, %v1475_v12, %v1281_v6  ;;  %v1219_v19 = vpop.permute.xlu1 %1218 }
 0x257   : > { %v1540_v47 = vsel %vm449_vm0, %v1508_v55, %v1313_v20  ;;  %v1444_v45 = vsel %vm1412_vm6, %v3813_v31, %v1219_v19 }
 0x259   : > { %v1345_v24 = vpop.permute.xlu0 %1344 }
 0x25a   : > { %v1573_v14 = vsel %vm1543_vm10, %v1540_v47, %v1345_v24  ;;  %v1347_v60 = vpop.permute.xlu1 %1346 }
 0x25b   : > { %v1606_v49 = vsel %vm1576_vm9, %v1573_v14, %v1377_v43 }
 0x25d   : > { %v1251_v34 = vpop.permute.xlu0 %1250 }
 0x25e   : > { %v1477_v5 = vsel %vm1445_vm7, %v1444_v45, %v1251_v34  ;;  %v1411_v53 = vpop.permute.xlu1 %1410 }
 0x25f   : > { %v1510_v50 = vsel %vm1478_vm8, %v1477_v5, %v1283_v63 }
 0x261   : > { %v1409_v27 = vpop.permute.xlu0 %1408 }
 0x262   : > { %v1653_v32 = vsel %vm1609_vm11, %v1606_v49, %v1409_v27 }
 0x263   : > { %1930 = vmatmul.mubr.bf16.gmra.mxu1 %v1653_v32 }
 0x264   : > { %2633 = vmatprep.mubr.msk.bf16.mxu1 %vm1412_vm6, %v3287_v28 }
 0x265   : > { %v1315_v62 = vpop.permute.xlu0 %1314 }
 0x266   : > { %v1542_v25 = vsel %vm449_vm0, %v1510_v50, %v1315_v62 }
 0x267   : > { %v1575_v31 = vsel %vm1543_vm10, %v1542_v25, %v1347_v60 }
 0x269   : > { %v1379_v18 = vpop.permute.xlu0 %1378 }
 0x26a   : > { %v1608_v61 = vsel %vm1576_vm9, %v1575_v31, %v1379_v18 }
 0x26b   : > { %v1819_v37 = vpop.f32.mrf.mxu0  ;;  %v1656_v30 = vsel %vm1609_vm11, %v1608_v61, %v1411_v53 }
 0x26c   : > { %1938 = vmatmul.mubr.bf16.gmra.mxu1 %v1656_v30  ;;  %v1820_v35 = vadd.f32 %v4012_v26, %v1819_v37 }
 0x26d   : > { %v1821_v28 = vpop.f32.mrf.mxu0 }
 0x26e   : > { %v1946_v23 = vmax.f32 %v1820_v35, 0.0 }
 0x26f   : > { %v1822_v52 = vpop.f32.mrf.mxu0 }
 0x270   : > { %v1823_v33 = vadd.f32 %v4012_v26, %v1822_v52 }
 0x271   : > { %v1824_v3 = vpop.f32.mrf.mxu0 }
 0x272   : > { %v1947_v29 = vmax.f32 %v1823_v33, 0.0 }
 0x274   : > { %v1978_v7 = vpack.c.bf16 %v1947_v29, %v1946_v23 }
 0x276   : > { %2802 = vmatprep.mubr.msk.bf16.mxu0 %vm1412_vm6, %v1978_v7 }
 0x277   : > { %v1827_v54 = vpop.f32.mrf.mxu1 }
 0x278   : > { %v1828_v51 = vadd.f32 %v4012_v26, %v1827_v54 }
 0x279   : > { %v1829_v43 = vpop.f32.mrf.mxu1 }
 0x27a   : > { %v1948_v57 = vmax.f32 %v1828_v51, 0.0 }
 0x27b   : > { %v1830_v22 = vpop.f32.mrf.mxu1 }
 0x27c   : > { %v1831_v2 = vadd.f32 %v4012_v26, %v1830_v22 }
 0x27d   : > { %v1832_v10 = vpop.f32.mrf.mxu1 }
 0x27e   : > { %v1949_v17 = vmax.f32 %v1831_v2, 0.0 }
 0x27f   : > { %v1835_v11 = vpop.f32.mrf.mxu1 }
 0x280   : > { %v1979_v4 = vpack.c.bf16 %v1949_v17, %v1948_v57  ;;  %v1836_v21 = vadd.f32 %v4012_v26, %v1835_v11 }
 0x281   : > { %v1837_v58 = vpop.f32.mrf.mxu1 }
 0x282   : > { %2803 = vmatmul.mubr.msk.bf16.vlgmr.msra.gmra.mxu0 %vm1412_vm6, %v1979_v4  ;;  %v1950_v0 = vmax.f32 %v1836_v21, 0.0 }
 0x283   : > { %v1838_v13 = vpop.f32.mrf.mxu1 }
 0x284   : > { %v1839_v44 = vadd.f32 %v4012_v26, %v1838_v13 }
 0x285   : > { %v1840_v39 = vpop.f32.mrf.mxu1 }
 0x286   : > { %v1951_v1 = vmax.f32 %v1839_v44, 0.0 }
 0x288   : > { %v1980_v41 = vpack.c.bf16 %v1951_v1, %v1950_v0 }
 0x28a   : > { %2806 = vmatprep.mubr.msk.bf16.mxu0 %vm1412_vm6, %v1980_v41 }
 0x293   : > { %v1843_v40 = vpop.f32.mrf.mxu1 }
 0x294   : > { %v1844_v38 = vadd.f32 %v4012_v26, %v1843_v40 }
 0x295   : > { %v1845_v36 = vpop.f32.mrf.mxu1 }
 0x296   : > { %v1952_v46 = vmax.f32 %v1844_v38, 0.0 }
 0x297   : > { %v1846_v8 = vpop.f32.mrf.mxu1 }
 0x298   : > { %v1847_v63 = vadd.f32 %v4012_v26, %v1846_v8 }
 0x299   : > { %v1848_v48 = vpop.f32.mrf.mxu1 }
 0x29a   : > { %v1953_v16 = vmax.f32 %v1847_v63, 0.0 }
 0x29b   : > { %v1851_v56 = vpop.f32.mrf.mxu1 }
 0x29c   : > { %v1981_v15 = vpack.c.bf16 %v1953_v16, %v1952_v46  ;;  %v1852_v42 = vadd.f32 %v4012_v26, %v1851_v56 }
 0x29d   : > { %v1853_v59 = vpop.f32.mrf.mxu1 }
 0x29e   : > { %2807 = vmatmul.mubr.msk.bf16.gmra.mxu0 %vm1412_vm6, %v1981_v15  ;;  %v1954_v12 = vmax.f32 %v1852_v42, 0.0 }
 0x29f   : > { %v1854_v6 = vpop.f32.mrf.mxu1 }
 0x2a0   : > { %v1855_v9 = vadd.f32 %v4012_v26, %v1854_v6 }
 0x2a1   : > { %v1856_v20 = vpop.f32.mrf.mxu1 }
 0x2a2   : > { %v1955_v24 = vmax.f32 %v1855_v9, 0.0 }
 0x2a4   : > { %v1982_v55 = vpack.c.bf16 %v1955_v24, %v1954_v12 }
 0x2a6   : > { %2810 = vmatprep.mubr.msk.bf16.mxu0 %vm1412_vm6, %v1982_v55 }
 0x2af   : > { %v1859_v47 = vpop.f32.mrf.mxu1 }
 0x2b0   : > { %v1860_v19 = vadd.f32 %v4012_v26, %v1859_v47 }
 0x2b1   : > { %v1861_v34 = vpop.f32.mrf.mxu1 }
 0x2b2   : > { %v1956_v49 = vmax.f32 %v1860_v19, 0.0 }
 0x2b3   : > { %v1862_v14 = vpop.f32.mrf.mxu1 }
 0x2b4   : > { %v1863_v45 = vadd.f32 %v4012_v26, %v1862_v14 }
 0x2b5   : > { %v1864_v27 = vpop.f32.mrf.mxu1 }
 0x2b6   : > { %v1957_v5 = vmax.f32 %v1863_v45, 0.0 }
 0x2b7   : > { %v1867_v32 = vpop.f32.mrf.mxu1 }
 0x2b8   : > { %v1983_v60 = vpack.c.bf16 %v1957_v5, %v1956_v49  ;;  %v1868_v62 = vadd.f32 %v4012_v26, %v1867_v32 }
 0x2b9   : > { %v1869_v50 = vpop.f32.mrf.mxu1 }
 0x2ba   : > { %2811 = vmatmul.mubr.msk.bf16.gmra.mxu0 %vm1412_vm6, %v1983_v60  ;;  %v1958_v18 = vmax.f32 %v1868_v62, 0.0 }
 0x2bb   : > { %v1870_v25 = vpop.f32.mrf.mxu1 }
 0x2bc   : > { %v1871_v53 = vadd.f32 %v4012_v26, %v1870_v25 }
 0x2bd   : > { %v1872_v31 = vpop.f32.mrf.mxu1 }
 0x2be   : > { %v1959_v61 = vmax.f32 %v1871_v53, 0.0 }
 0x2c0   : > { %v1984_v37 = vpack.c.bf16 %v1959_v61, %v1958_v18 }
 0x2c2   : > { %2814 = vmatprep.mubr.msk.bf16.mxu0 %vm1412_vm6, %v1984_v37 }
 0x2d3   : > { %v1875_v30 = vpop.f32.mrf.mxu1 }
 0x2d4   : > { %v1876_v35 = vadd.f32 %v4012_v26, %v1875_v30 }
 0x2d5   : > { %v1877_v28 = vpop.f32.mrf.mxu1 }
 0x2d6   : > { %v1960_v23 = vmax.f32 %v1876_v35, 0.0 }
 0x2d7   : > { %v1878_v52 = vpop.f32.mrf.mxu1 }
 0x2d8   : > { %v1879_v33 = vadd.f32 %v4012_v26, %v1878_v52 }
 0x2d9   : > { %v1880_v3 = vpop.f32.mrf.mxu1 }
 0x2da   : > { %v1961_v29 = vmax.f32 %v1879_v33, 0.0 }
 0x2db   : > { %v1883_v7 = vpop.f32.mrf.mxu1 }
 0x2dc   : > { %v1985_v54 = vpack.c.bf16 %v1961_v29, %v1960_v23  ;;  %v1884_v51 = vadd.f32 %v4012_v26, %v1883_v7 }
 0x2dd   : > { %v1885_v43 = vpop.f32.mrf.mxu1 }
 0x2de   : > { %2815 = vmatmul.mubr.msk.bf16.gmra.mxu0 %vm1412_vm6, %v1985_v54  ;;  %v1962_v57 = vmax.f32 %v1884_v51, 0.0 }
 0x2df   : > { %v1886_v22 = vpop.f32.mrf.mxu1 }
 0x2e0   : > { %v1887_v2 = vadd.f32 %v4012_v26, %v1886_v22 }
 0x2e1   : > { %v1888_v10 = vpop.f32.mrf.mxu1 }
 0x2e2   : > { %v1963_v17 = vmax.f32 %v1887_v2, 0.0 }
 0x2e4   : > { %v1986_v11 = vpack.c.bf16 %v1963_v17, %v1962_v57 }
 0x2e6   : > { %2818 = vmatprep.mubr.msk.bf16.mxu0 %vm1412_vm6, %v1986_v11 }
 0x2e8   : > { %v1891_v4 = vpop.f32.mrf.mxu1 }
 0x2e9   : > { %v1892_v21 = vadd.f32 %v4012_v26, %v1891_v4  ;;  %v4066_v4 = vld [vmem:[%s4242_s6] ss:$0 sm:$0xff] }
 0x2ea   : > { %v1893_v58 = vpop.f32.mrf.mxu1 }
 0x2eb   : > { %v1964_v0 = vmax.f32 %v1892_v21, 0.0  ;;  %v2955_v58 = vld [vmem:[%s3221_s15 + $0x8] sm:$0xff]  }
 0x2ec   : > { %v1894_v13 = vpop.f32.mrf.mxu1  ;;  %v2220_v21 = vunpack.c.l.bf16 %v2955_v58 }
 0x2ed   : > { %v1895_v44 = vadd.f32 %v4012_v26, %v1894_v13 }
 0x2ee   : > { %v1896_v39 = vpop.f32.mrf.mxu1 }
 0x2ef   : > { %v1965_v1 = vmax.f32 %v1895_v44, 0.0  ;;  %v2956_v44 = vld [vmem:[%s3221_s15] sm:$0xff]  }
 0x2f0   : > { %v1899_v41 = vpop.f32.mrf.mxu1  ;;  %v2218_v39 = vunpack.c.l.bf16 %v2956_v44 }
 0x2f1   : > { %v1987_v40 = vpack.c.bf16 %v1965_v1, %v1964_v0  ;;  %v1900_v38 = vadd.f32 %v4012_v26, %v1899_v41 }
 0x2f2   : > { %v1901_v36 = vpop.f32.mrf.mxu1 }
 0x2f3   : > { %2819 = vmatmul.mubr.msk.bf16.gmra.mxu0 %vm1412_vm6, %v1987_v40  ;;  %v1966_v46 = vmax.f32 %v1900_v38, 0.0  ;;  %v2221_v40 = vunpack.c.h.bf16 %v2955_v58  ;;  %v2219_v38 = vunpack.c.h.bf16 %v2956_v44 }
 0x2f4   : > { %v1902_v8 = vpop.f32.mrf.mxu1 }
 0x2f5   : > { %v1903_v63 = vadd.f32 %v4012_v26, %v1902_v8 }
 0x2f6   : > { %v1904_v48 = vpop.f32.mrf.mxu1 }
 0x2f7   : > { %v1967_v16 = vmax.f32 %v1903_v63, 0.0 }
 0x2f9   : > { %v1988_v56 = vpack.c.bf16 %v1967_v16, %v1966_v46 }
 0x2fb   : > { %2822 = vmatprep.mubr.msk.bf16.mxu0 %vm1412_vm6, %v1988_v56 }
 0x300   : > { %v1907_v15 = vpop.f32.mrf.mxu1 }
 0x301   : > { %v1908_v42 = vadd.f32 %v4012_v26, %v1907_v15 }
 0x302   : > { %v1909_v59 = vpop.f32.mrf.mxu1 }
 0x303   : > { %v1968_v12 = vmax.f32 %v1908_v42, 0.0 }
 0x304   : > { %v1910_v6 = vpop.f32.mrf.mxu1 }
 0x305   : > { %v1911_v9 = vadd.f32 %v4012_v26, %v1910_v6 }
 0x306   : > { %v1912_v20 = vpop.f32.mrf.mxu1 }
 0x307   : > { %v1969_v24 = vmax.f32 %v1911_v9, 0.0 }
 0x308   : > { %v1915_v55 = vpop.f32.mrf.mxu1 }
 0x309   : > { %v1989_v47 = vpack.c.bf16 %v1969_v24, %v1968_v12  ;;  %v1916_v19 = vadd.f32 %v4012_v26, %v1915_v55  ;;  %v2957_v55 = vld [vmem:[%s3221_s15 + $0x18] sm:$0xff]  }
 0x30a   : > { %v1917_v34 = vpop.f32.mrf.mxu1 }
 0x30b   : > { %2823 = vmatmul.mubr.msk.bf16.gmra.mxu0 %vm1412_vm6, %v1989_v47  ;;  %v1970_v49 = vmax.f32 %v1916_v19, 0.0  ;;  %v2224_v47 = vunpack.c.l.bf16 %v2957_v55 }
 0x30c   : > { %v1918_v14 = vpop.f32.mrf.mxu1 }
 0x30d   : > { %v1919_v45 = vadd.f32 %v4012_v26, %v1918_v14  ;;  %v2958_v14 = vld [vmem:[%s3221_s15 + $0x10] sm:$0xff]  }
 0x30e   : > { %v1920_v27 = vpop.f32.mrf.mxu1 }
 0x30f   : > { %v1971_v5 = vmax.f32 %v1919_v45, 0.0  ;;  %v2222_v45 = vunpack.c.l.bf16 %v2958_v14 }
 0x311   : > { %v1990_v32 = vpack.c.bf16 %v1971_v5, %v1970_v49 }
 0x313   : > { %2826 = vmatprep.mubr.msk.bf16.mxu0 %vm1412_vm6, %v1990_v32  ;;  %v2225_v32 = vunpack.c.h.bf16 %v2957_v55 }
 0x314   : > { %v1923_v60 = vpop.f32.mrf.mxu1 }
 0x315   : > { %v1924_v62 = vadd.f32 %v4012_v26, %v1923_v60 }
 0x316   : > { %v1925_v50 = vpop.f32.mrf.mxu1 }
 0x317   : > { %v1972_v18 = vmax.f32 %v1924_v62, 0.0 }
 0x318   : > { %v1926_v25 = vpop.f32.mrf.mxu1 }
 0x319   : > { %v1927_v53 = vadd.f32 %v4012_v26, %v1926_v25 }
 0x31a   : > { %v1928_v31 = vpop.f32.mrf.mxu1 }
 0x31b   : > { %v1973_v61 = vmax.f32 %v1927_v53, 0.0  ;;  %v2223_v53 = vunpack.c.h.bf16 %v2958_v14 }
 0x31d   : > { %v1991_v37 = vpack.c.bf16 %v1973_v61, %v1972_v18 }
 0x31f   : > { %2827 = vmatmul.mubr.msk.bf16.gmra.mxu0 %vm1412_vm6, %v1991_v37 }
 0x323   : > { %v1931_v30 = vpop.f32.mrf.mxu1 }
 0x324   : > { %v1932_v35 = vadd.f32 %v4012_v26, %v1931_v30 }
 0x325   : > { %v1933_v28 = vpop.f32.mrf.mxu1 }
 0x326   : > { %v1974_v23 = vmax.f32 %v1932_v35, 0.0 }
 0x327   : > { %v1934_v52 = vpop.f32.mrf.mxu1 }
 0x328   : > { %v1935_v33 = vadd.f32 %v4012_v26, %v1934_v52 }
 0x329   : > { %v1936_v3 = vpop.f32.mrf.mxu1 }
 0x32a   : > { %v1975_v29 = vmax.f32 %v1935_v33, 0.0 }
 0x32c   : > { %v1992_v7 = vpack.c.bf16 %v1975_v29, %v1974_v23  ;;  %v1939_v54 = vpop.f32.mrf.mxu1  ;;  %v2959_v29 = vld [vmem:[%s3221_s15 + $0x28] sm:$0xff]  }
 0x32d   : > { %v1940_v51 = vadd.f32 %v4012_v26, %v1939_v54 }
 0x32e   : > { %v1941_v43 = vpop.f32.mrf.mxu1  ;;  %2830 = vmatprep.mubr.msk.bf16.mxu0 %vm1412_vm6, %v1992_v7  ;;  %v2228_v7 = vunpack.c.l.bf16 %v2959_v29 }
 0x32f   : > { %v1976_v57 = vmax.f32 %v1940_v51, 0.0  ;;  %v2960_v51 = vld [vmem:[%s3221_s15 + $0x20] sm:$0xff]  }
 0x330   : > { %v1942_v22 = vpop.f32.mrf.mxu1  ;;  %v2227_v44 = vunpack.c.h.bf16 %v2960_v51 }
 0x331   : > { %v1943_v2 = vadd.f32 %v4012_v26, %v1942_v22  ;;  %v2226_v22 = vunpack.c.l.bf16 %v2960_v51 }
 0x332   : > { %v1944_v10 = vpop.f32.mrf.mxu1 }
 0x333   : > { %v1977_v17 = vmax.f32 %v1943_v2, 0.0 }
 0x335   : > { %v1993_v11 = vpack.c.bf16 %v1977_v17, %v1976_v57  ;;  %v2229_v17 = vunpack.c.h.bf16 %v2959_v29 }
 0x337   : > { %2831 = vmatmul.mubr.msk.bf16.gmra.mxu0 %vm1412_vm6, %v1993_v11 }
 0x342   : > { %v2804_v13 = vpop.f32.mrf.mxu0 }
 0x343   : > { %v2100_v0 = vadd.f32 %v2804_v13, %v4066_v4 }
 0x344   : > { %v2091_v26 = vpop.f32.mrf.mxu0 }
 0x345   : > { %v2252_v1 = vadd.f32 %v2220_v21, %v2100_v0  ;;  %v2092_v41 = vadd.f32 %v4066_v4, %v2091_v26 }
 0x346   : > { %v2805_v36 = vpop.f32.mrf.mxu0 }
 0x347   : > { %v2284_v8 = vmax.f32 %v2252_v1, 0.0  ;;  %v2250_v63 = vadd.f32 %v2218_v39, %v2092_v41  ;;  %v2103_v48 = vadd.f32 %v2805_v36, %v4066_v4 }
 0x348   : > { %v2094_v46 = vpop.f32.mrf.mxu0 }
 0x349   : > { %v2692_v16 = vpack.c.bf16 %v2284_v8, %v2284_v8  ;;  %v2282_v56 = vmax.f32 %v2250_v63, 0.0  ;;  %v2253_v15 = vadd.f32 %v2221_v40, %v2103_v48  ;;  %v2095_v59 = vadd.f32 %v4066_v4, %v2094_v46  ;;  %v2961_v46 = vld [vmem:[%s3221_s15 + $0x38] sm:$0xff]  }
 0x34b   : > { %2445 = vst.msk [vmem:[%s4076_s22 + $0x8] sm:$0xf] %vm2442_vm12, %v2692_v16  ;;  %v2690_v42 = vpack.c.bf16 %v2282_v56, %v2282_v56  ;;  %v2285_v6 = vmax.f32 %v2253_v15, 0.0  ;;  %v2251_v9 = vadd.f32 %v2219_v38, %v2095_v59  ;;  %v2232_v16 = vunpack.c.l.bf16 %v2961_v46  ;;  %v2962_v59 = vld [vmem:[%s3221_s15 + $0x30] sm:$0xff]  }
 0x34d   : > { %2443 = vst.msk [vmem:[%s4076_s22] sm:$0xf] %vm2442_vm12, %v2690_v42  ;;  %v2693_v20 = vpack.c.bf16 %v2285_v6, %v2285_v6  ;;  %v2283_v12 = vmax.f32 %v2251_v9, 0.0  ;;  %v2230_v42 = vunpack.c.l.bf16 %v2962_v59 }
 0x34f   : > { %2446 = vst.msk [vmem:[%s4076_s22 + $0xc] sm:$0xf] %vm2442_vm12, %v2693_v20  ;;  %v2691_v24 = vpack.c.bf16 %v2283_v12, %v2283_v12  ;;  %v2233_v12 = vunpack.c.h.bf16 %v2961_v46 }
 0x351   : > { %2444 = vst.msk [vmem:[%s4076_s22 + $0x4] sm:$0xf] %vm2442_vm12, %v2691_v24 }
 0x35e   : > { %v2808_v34 = vpop.f32.mrf.mxu0 }
 0x35f   : > { %v2116_v19 = vadd.f32 %v2808_v34, %v4066_v4 }
 0x360   : > { %v2107_v27 = vpop.f32.mrf.mxu0 }
 0x361   : > { %v2256_v49 = vadd.f32 %v2224_v47, %v2116_v19  ;;  %v2108_v5 = vadd.f32 %v4066_v4, %v2107_v27  ;;  %v2231_v19 = vunpack.c.h.bf16 %v2962_v59 }
 0x362   : > { %v2809_v60 = vpop.f32.mrf.mxu0 }
 0x363   : > { %v2288_v50 = vmax.f32 %v2256_v49, 0.0  ;;  %v2254_v62 = vadd.f32 %v2222_v45, %v2108_v5  ;;  %v2119_v25 = vadd.f32 %v2809_v60, %v4066_v4 }
 0x364   : > { %v2110_v31 = vpop.f32.mrf.mxu0 }
 0x365   : > { %v2696_v18 = vpack.c.bf16 %v2288_v50, %v2288_v50  ;;  %v2286_v61 = vmax.f32 %v2254_v62, 0.0  ;;  %v2257_v37 = vadd.f32 %v2225_v32, %v2119_v25  ;;  %v2111_v30 = vadd.f32 %v4066_v4, %v2110_v31  ;;  %v2963_v31 = vld [vmem:[%s3221_s15 + $0x48] sm:$0xff]  }
 0x367   : > { %2449 = vst.msk [vmem:[%s4076_s22 + $0x18] sm:$0xf] %vm2442_vm12, %v2696_v18  ;;  %v2694_v28 = vpack.c.bf16 %v2286_v61, %v2286_v61  ;;  %v2289_v35 = vmax.f32 %v2257_v37, 0.0  ;;  %v2255_v52 = vadd.f32 %v2223_v53, %v2111_v30  ;;  %v2236_v18 = vunpack.c.l.bf16 %v2963_v31  ;;  %v2964_v30 = vld [vmem:[%s3221_s15 + $0x40] sm:$0xff]  }
 0x369   : > { %2447 = vst.msk [vmem:[%s4076_s22 + $0x10] sm:$0xf] %vm2442_vm12, %v2694_v28  ;;  %v2697_v33 = vpack.c.bf16 %v2289_v35, %v2289_v35  ;;  %v2287_v3 = vmax.f32 %v2255_v52, 0.0  ;;  %v2234_v28 = vunpack.c.l.bf16 %v2964_v30 }
 0x36b   : > { %2450 = vst.msk [vmem:[%s4076_s22 + $0x1c] sm:$0xf] %vm2442_vm12, %v2697_v33  ;;  %v2695_v23 = vpack.c.bf16 %v2287_v3, %v2287_v3  ;;  %v2237_v3 = vunpack.c.h.bf16 %v2963_v31 }
 0x36d   : > { %2448 = vst.msk [vmem:[%s4076_s22 + $0x14] sm:$0xf] %vm2442_vm12, %v2695_v23 }
 0x37a   : > { %v2812_v54 = vpop.f32.mrf.mxu0 }
 0x37b   : > { %v2132_v43 = vadd.f32 %v2812_v54, %v4066_v4 }
 0x37c   : > { %v2123_v2 = vpop.f32.mrf.mxu0 }
 0x37d   : > { %v2260_v10 = vadd.f32 %v2228_v7, %v2132_v43  ;;  %v2124_v57 = vadd.f32 %v4066_v4, %v2123_v2  ;;  %v2235_v43 = vunpack.c.h.bf16 %v2964_v30 }
 0x37e   : > { %v2813_v11 = vpop.f32.mrf.mxu0 }
 0x37f   : > { %v2292_v58 = vmax.f32 %v2260_v10, 0.0  ;;  %v2258_v21 = vadd.f32 %v2226_v22, %v2124_v57  ;;  %v2135_v13 = vadd.f32 %v2813_v11, %v4066_v4 }
 0x380   : > { %v2126_v39 = vpop.f32.mrf.mxu0 }
 0x381   : > { %v2700_v0 = vpack.c.bf16 %v2292_v58, %v2292_v58  ;;  %v2290_v26 = vmax.f32 %v2258_v21, 0.0  ;;  %v2261_v1 = vadd.f32 %v2229_v17, %v2135_v13  ;;  %v2127_v41 = vadd.f32 %v4066_v4, %v2126_v39  ;;  %v2965_v39 = vld [vmem:[%s3221_s15 + $0x58] sm:$0xff]  }
 0x383   : > { %2453 = vst.msk [vmem:[%s4076_s22 + $0x28] sm:$0xf] %vm2442_vm12, %v2700_v0  ;;  %v2698_v40 = vpack.c.bf16 %v2290_v26, %v2290_v26  ;;  %v2293_v36 = vmax.f32 %v2261_v1, 0.0  ;;  %v2259_v38 = vadd.f32 %v2227_v44, %v2127_v41  ;;  %v2240_v0 = vunpack.c.l.bf16 %v2965_v39  ;;  %v2966_v41 = vld [vmem:[%s3221_s15 + $0x50] sm:$0xff]  }
 0x385   : > { %2451 = vst.msk [vmem:[%s4076_s22 + $0x20] sm:$0xf] %vm2442_vm12, %v2698_v40  ;;  %v2701_v8 = vpack.c.bf16 %v2293_v36, %v2293_v36  ;;  %v2291_v63 = vmax.f32 %v2259_v38, 0.0  ;;  %v2238_v40 = vunpack.c.l.bf16 %v2966_v41 }
 0x387   : > { %2454 = vst.msk [vmem:[%s4076_s22 + $0x2c] sm:$0xf] %vm2442_vm12, %v2701_v8  ;;  %v2699_v48 = vpack.c.bf16 %v2291_v63, %v2291_v63  ;;  %v2241_v63 = vunpack.c.h.bf16 %v2965_v39 }
 0x389   : > { %2452 = vst.msk [vmem:[%s4076_s22 + $0x24] sm:$0xf] %vm2442_vm12, %v2699_v48 }
 0x39e   : > { %v2816_v56 = vpop.f32.mrf.mxu0 }
 0x39f   : > { %v2148_v15 = vadd.f32 %v2816_v56, %v4066_v4 }
 0x3a0   : > { %v2139_v6 = vpop.f32.mrf.mxu0 }
 0x3a1   : > { %v2264_v9 = vadd.f32 %v2232_v16, %v2148_v15  ;;  %v2140_v20 = vadd.f32 %v4066_v4, %v2139_v6  ;;  %v2239_v15 = vunpack.c.h.bf16 %v2966_v41 }
 0x3a2   : > { %v2817_v24 = vpop.f32.mrf.mxu0 }
 0x3a3   : > { %v2296_v55 = vmax.f32 %v2264_v9, 0.0  ;;  %v2262_v47 = vadd.f32 %v2230_v42, %v2140_v20  ;;  %v2151_v34 = vadd.f32 %v2817_v24, %v4066_v4 }
 0x3a4   : > { %v2142_v14 = vpop.f32.mrf.mxu0 }
 0x3a5   : > { %v2704_v45 = vpack.c.bf16 %v2296_v55, %v2296_v55  ;;  %v2294_v27 = vmax.f32 %v2262_v47, 0.0  ;;  %v2265_v49 = vadd.f32 %v2233_v12, %v2151_v34  ;;  %v2143_v5 = vadd.f32 %v4066_v4, %v2142_v14  ;;  %v2967_v14 = vld [vmem:[%s3221_s15 + $0x68] sm:$0xff]  }
 0x3a7   : > { %2457 = vst.msk [vmem:[%s4076_s22 + $0x38] sm:$0xf] %vm2442_vm12, %v2704_v45  ;;  %v2702_v32 = vpack.c.bf16 %v2294_v27, %v2294_v27  ;;  %v2297_v60 = vmax.f32 %v2265_v49, 0.0  ;;  %v2263_v50 = vadd.f32 %v2231_v19, %v2143_v5  ;;  %v2244_v45 = vunpack.c.l.bf16 %v2967_v14  ;;  %v2968_v5 = vld [vmem:[%s3221_s15 + $0x60] sm:$0xff]  }
 0x3a9   : > { %2455 = vst.msk [vmem:[%s4076_s22 + $0x30] sm:$0xf] %vm2442_vm12, %v2702_v32  ;;  %v2705_v62 = vpack.c.bf16 %v2297_v60, %v2297_v60  ;;  %v2295_v25 = vmax.f32 %v2263_v50, 0.0  ;;  %v2242_v32 = vunpack.c.l.bf16 %v2968_v5 }
 0x3ab   : > { %2458 = vst.msk [vmem:[%s4076_s22 + $0x3c] sm:$0xf] %vm2442_vm12, %v2705_v62  ;;  %v2703_v53 = vpack.c.bf16 %v2295_v25, %v2295_v25  ;;  %v2245_v25 = vunpack.c.h.bf16 %v2967_v14 }
 0x3ad   : > { %2456 = vst.msk [vmem:[%s4076_s22 + $0x34] sm:$0xf] %vm2442_vm12, %v2703_v53 }
 0x3b3   : > { %v2820_v61 = vpop.f32.mrf.mxu0 }
 0x3b4   : > { %v2164_v37 = vadd.f32 %v2820_v61, %v4066_v4 }
 0x3b5   : > { %v2155_v35 = vpop.f32.mrf.mxu0 }
 0x3b6   : > { %v2268_v52 = vadd.f32 %v2236_v18, %v2164_v37  ;;  %v2156_v33 = vadd.f32 %v4066_v4, %v2155_v35  ;;  %v2243_v37 = vunpack.c.h.bf16 %v2968_v5 }
 0x3b7   : > { %v2821_v23 = vpop.f32.mrf.mxu0 }
 0x3b8   : > { %v2300_v29 = vmax.f32 %v2268_v52, 0.0  ;;  %v2266_v7 = vadd.f32 %v2234_v28, %v2156_v33  ;;  %v2167_v54 = vadd.f32 %v2821_v23, %v4066_v4 }
 0x3b9   : > { %v2158_v51 = vpop.f32.mrf.mxu0 }
 0x3ba   : > { %v2708_v22 = vpack.c.bf16 %v2300_v29, %v2300_v29  ;;  %v2298_v2 = vmax.f32 %v2266_v7, 0.0  ;;  %v2269_v10 = vadd.f32 %v2237_v3, %v2167_v54  ;;  %v2159_v57 = vadd.f32 %v4066_v4, %v2158_v51  ;;  %v2969_v51 = vld [vmem:[%s3221_s15 + $0x78] sm:$0xff]  }
 0x3bc   : > { %2461 = vst.msk [vmem:[%s4076_s22 + $0x48] sm:$0xf] %vm2442_vm12, %v2708_v22  ;;  %v2706_v17 = vpack.c.bf16 %v2298_v2, %v2298_v2  ;;  %v2301_v11 = vmax.f32 %v2269_v10, 0.0  ;;  %v2267_v58 = vadd.f32 %v2235_v43, %v2159_v57  ;;  %v2248_v22 = vunpack.c.l.bf16 %v2969_v51  ;;  %v2970_v57 = vld [vmem:[%s3221_s15 + $0x70] sm:$0xff]   ;;  %s2489_s15 = sshll.u32 %s4076_s22, 4  ;;  %s4189_s15 = int_to_ptr.vmem [resolvable:$true] %s2489_s15 }
 0x3bd   : > { %s2999_s8 = scalar_lea.vmem %s4189_s15, 2048  ;;  %p3006_p5 = scmp.lt.s32.totalorder %s4189_s15, %s3004_s23 }
 0x3be   : > { %2459 = vst.msk [vmem:[%s4076_s22 + $0x40] sm:$0xf] %vm2442_vm12, %v2706_v17  ;;  %v2709_v21 = vpack.c.bf16 %v2301_v11, %v2301_v11  ;;  %v2299_v13 = vmax.f32 %v2267_v58, 0.0  ;;  %v2246_v17 = vunpack.c.l.bf16 %v2970_v57  ;;  %p3000_p11 = scmp.ne.s32.totalorder %s4189_s15, %s2999_s8  ;;  %p3007_p7 = scmp.lt.s32.totalorder %s3005_s29, %s2999_s8 }
 0x3c0   : > { %2462 = vst.msk [vmem:[%s4076_s22 + $0x4c] sm:$0xf] %vm2442_vm12, %v2709_v21  ;;  %v2707_v44 = vpack.c.bf16 %v2299_v13, %v2299_v13  ;;  %v2249_v13 = vunpack.c.h.bf16 %v2969_v51  ;;  %p3001_p13 = pnand %p3000_p11, %p4254_p12  ;;  %p3008_p8 = por %p3007_p7, %p3006_p5 }
 0x3c2   : > { %2460 = vst.msk [vmem:[%s4076_s22 + $0x44] sm:$0xf] %vm2442_vm12, %v2707_v44  ;;  %p3002_p4 = pneg %p3001_p13 }
 0x3c4   : > { %p3009_p10 = pnand %p3008_p8, %p3002_p4 }
 0x3cb   : > { %v2824_v26 = vpop.f32.mrf.mxu0 }
 0x3cc   : > { %v2180_v1 = vadd.f32 %v2824_v26, %v4066_v4 }
 0x3cd   : > { %v2171_v36 = vpop.f32.mrf.mxu0 }
 0x3ce   : > { %v2272_v38 = vadd.f32 %v2240_v0, %v2180_v1  ;;  %v2172_v8 = vadd.f32 %v4066_v4, %v2171_v36  ;;  %v2247_v1 = vunpack.c.h.bf16 %v2970_v57 }
 0x3cf   : > { %v2825_v48 = vpop.f32.mrf.mxu0 }
 0x3d0   : > { %v2304_v46 = vmax.f32 %v2272_v38, 0.0  ;;  %v2270_v16 = vadd.f32 %v2238_v40, %v2172_v8  ;;  %v2183_v56 = vadd.f32 %v2825_v48, %v4066_v4 }
 0x3d1   : > { %v2174_v59 = vpop.f32.mrf.mxu0 }
 0x3d2   : > { %v2712_v42 = vpack.c.bf16 %v2304_v46, %v2304_v46  ;;  %v2302_v6 = vmax.f32 %v2270_v16, 0.0  ;;  %v2273_v9 = vadd.f32 %v2241_v63, %v2183_v56  ;;  %v2175_v20 = vadd.f32 %v4066_v4, %v2174_v59 }
 0x3d4   : > { %2465 = vst.msk [vmem:[%s4076_s22 + $0x58] sm:$0xf] %vm2442_vm12, %v2712_v42  ;;  %v2710_v12 = vpack.c.bf16 %v2302_v6, %v2302_v6  ;;  %v2305_v24 = vmax.f32 %v2273_v9, 0.0  ;;  %v2271_v55 = vadd.f32 %v2239_v15, %v2175_v20 }
 0x3d6   : > { %2463 = vst.msk [vmem:[%s4076_s22 + $0x50] sm:$0xf] %vm2442_vm12, %v2710_v12  ;;  %v2713_v47 = vpack.c.bf16 %v2305_v24, %v2305_v24  ;;  %v2303_v34 = vmax.f32 %v2271_v55, 0.0 }
 0x3d8   : > { %2466 = vst.msk [vmem:[%s4076_s22 + $0x5c] sm:$0xf] %vm2442_vm12, %v2713_v47  ;;  %v2711_v19 = vpack.c.bf16 %v2303_v34, %v2303_v34 }
 0x3da   : > { %2464 = vst.msk [vmem:[%s4076_s22 + $0x54] sm:$0xf] %vm2442_vm12, %v2711_v19 }
 0x3df   : > { %v2828_v27 = vpop.f32.mrf.mxu0 }
 0x3e0   : > { %v2196_v49 = vadd.f32 %v2828_v27, %v4066_v4 }
 0x3e1   : > { %v2187_v60 = vpop.f32.mrf.mxu0 }
 0x3e2   : > { %v2276_v50 = vadd.f32 %v2244_v45, %v2196_v49  ;;  %v2188_v62 = vadd.f32 %v4066_v4, %v2187_v60 }
 0x3e3   : > { %v2829_v53 = vpop.f32.mrf.mxu0 }
 0x3e4   : > { %v2308_v31 = vmax.f32 %v2276_v50, 0.0  ;;  %v2274_v18 = vadd.f32 %v2242_v32, %v2188_v62  ;;  %v2199_v61 = vadd.f32 %v2829_v53, %v4066_v4 }
 0x3e5   : > { %v2190_v30 = vpop.f32.mrf.mxu0 }
 0x3e6   : > { %v2716_v28 = vpack.c.bf16 %v2308_v31, %v2308_v31  ;;  %v2306_v35 = vmax.f32 %v2274_v18, 0.0  ;;  %v2277_v52 = vadd.f32 %v2245_v25, %v2199_v61  ;;  %v2191_v33 = vadd.f32 %v4066_v4, %v2190_v30 }
 0x3e8   : > { %2469 = vst.msk [vmem:[%s4076_s22 + $0x68] sm:$0xf] %vm2442_vm12, %v2716_v28  ;;  %v2714_v3 = vpack.c.bf16 %v2306_v35, %v2306_v35  ;;  %v2309_v23 = vmax.f32 %v2277_v52, 0.0  ;;  %v2275_v29 = vadd.f32 %v2243_v37, %v2191_v33 }
 0x3ea   : > { %2467 = vst.msk [vmem:[%s4076_s22 + $0x60] sm:$0xf] %vm2442_vm12, %v2714_v3  ;;  %v2717_v7 = vpack.c.bf16 %v2309_v23, %v2309_v23  ;;  %v2307_v54 = vmax.f32 %v2275_v29, 0.0 }
 0x3ec   : > { %2470 = vst.msk [vmem:[%s4076_s22 + $0x6c] sm:$0xf] %vm2442_vm12, %v2717_v7  ;;  %v2715_v43 = vpack.c.bf16 %v2307_v54, %v2307_v54 }
 0x3ee   : > { %2468 = vst.msk [vmem:[%s4076_s22 + $0x64] sm:$0xf] %vm2442_vm12, %v2715_v43 }
 0x3f7   : > { %v2832_v2 = vpop.f32.mrf.mxu0 }
 0x3f8   : > { %v2212_v10 = vadd.f32 %v2832_v2, %v4066_v4 }
 0x3f9   : > { %v2203_v11 = vpop.f32.mrf.mxu0 }
 0x3fa   : > { %v2280_v58 = vadd.f32 %v2248_v22, %v2212_v10  ;;  %v2204_v21 = vadd.f32 %v4066_v4, %v2203_v11 }
 0x3fb   : > { %v2833_v44 = vpop.f32.mrf.mxu0 }
 0x3fc   : > { %v2312_v39 = vmax.f32 %v2280_v58, 0.0  ;;  %v2278_v0 = vadd.f32 %v2246_v17, %v2204_v21  ;;  %v2215_v26 = vadd.f32 %v2833_v44, %v4066_v4 }
 0x3fd   : > { %v2206_v41 = vpop.f32.mrf.mxu0 }
 0x3fe   : > { %v2720_v40 = vpack.c.bf16 %v2312_v39, %v2312_v39  ;;  %v2310_v36 = vmax.f32 %v2278_v0, 0.0  ;;  %v2281_v38 = vadd.f32 %v2249_v13, %v2215_v26  ;;  %v2207_v8 = vadd.f32 %v4066_v4, %v2206_v41 }
 0x400   : > { %2473 = vst.msk [vmem:[%s4076_s22 + $0x78] sm:$0xf] %vm2442_vm12, %v2720_v40  ;;  %v2718_v63 = vpack.c.bf16 %v2310_v36, %v2310_v36  ;;  %v2313_v48 = vmax.f32 %v2281_v38, 0.0  ;;  %v2279_v46 = vadd.f32 %v2247_v1, %v2207_v8 }
 0x402   : > { %2471 = vst.msk [vmem:[%s4076_s22 + $0x70] sm:$0xf] %vm2442_vm12, %v2718_v63  ;;  %v2721_v16 = vpack.c.bf16 %v2313_v48, %v2313_v48  ;;  %v2311_v56 = vmax.f32 %v2279_v46, 0.0 }
 0x404   : > { %2474 = vst.msk [vmem:[%s4076_s22 + $0x7c] sm:$0xf] %vm2442_vm12, %v2721_v16  ;;  %v2719_v4 = vpack.c.bf16 %v2311_v56, %v2311_v56 }
 0x406   : > { %2472 = vst.msk [vmem:[%s4076_s22 + $0x74] sm:$0xf] %vm2442_vm12, %v2719_v4 }
 0x407   : > { %3012 = shalt.err (!%p3009_p10)
}
 0x408   : > { %s3013_s12 = scalar_lea.hbm %s4185_s18, 2048  ;;  %s3017_s11 = scalar_lea.hbm %s4243_s7, 4096 }
 0x409   : > { %p3014_p0 = scmp.ne.s32.totalorder %s4185_s18, %s3013_s12  ;;  %p3018_p1 = scmp.lt.s32.totalorder %s4185_s18, %s4243_s7 }
 0x40a   : > { %p3019_p3 = scmp.lt.s32.totalorder %s3017_s11, %s3013_s12 }
 0x40b   : > { %p3015_p2 = pnand %p3014_p0, %p4254_p12 }
 0x40c   : > { %p3020_p6 = por %p3019_p3, %p3018_p1 }
 0x40d   : > { %p3016_p9 = pneg %p3015_p2 }
 0x40f   : > { %p3021_p11 = pnand %p3020_p6, %p3016_p9 }
 0x411   : > { %3024 = shalt.err (!%p3021_p11)
}
 0x412   : > { %s3077_s8 = smov 4  }
 0x413   : > { %2854 = dma.vmem_to_hbm [thread:$0]  (%p4254_p12), %s4189_s15, 2048, %s4185_s18, %s2476_s28, %s3074_s19, %s3074_s19, %s3077_s8  }
 0x414 PF: > { %s2504_s16 = sand.u32 1, %s3051_s24   ;;  %p4255_p13 = scmp.ne.s32.totalorder %s4249_s14, 0 }
 0x415   : > { %p4256_p4 = scmp.ge.s32.totalorder %s3063_s27, 2  ;;  %s2505_s23 = scalar_lea.sflag [#allocation4], %s2504_s16 }
 0x417   : > { %p2861_p5 = pnand %p4256_p4, %p4255_p13 }
 0x419   : > { %p2862_p7 = pneg %p2861_p5 }
 0x41b   : > { %3046 = dma.done.wait (%p2862_p7), %s2505_s23, 2048  }
 0x41c   : > { %3048 = vsyncadd (%p2862_p7), %s2505_s23, 4294965248  ;;  %p20_p8 = scmp.ge.s32.totalorder %s3143_s30, 4   ;;  %s4257_s24 = smov %s3055_s25 }
 0x41d   : > { %s4258_s25 = smov %s3059_s26  ;;  %s4259_s26 = smov %s3155_s10 }
 0x41e   : > { %s4260_s27 = smov %s3143_s30  ;;  %22 = sbr.rel (!%p20_p8) target bundleno = 5 (0x5), region = 93 }
 0x423   :  { %2510 = vsyncpa [#allocation3], 1 }
 0x424   :  { %2512 = vsyncpa [#allocation3 + $0x1], 1 }
 0x425   :  { %2513 = vsyncpa [#allocation4], 1 }
 0x426   :  { %2515 = vsyncpa [#allocation4 + $0x1], 1 }

</bundles_post_ra>
